<compile_context>
chip_gen: v7x
topology: tpu7x:2x2x1
jax: 0.10.0
libtpu: 0.0.40
codegen_flags: <defaults>
</compile_context>

<pallas_src>
import functools
import math

import jax
import jax.numpy as jnp
from jax import lax
from jax.experimental import pallas as pl
from jax.experimental.pallas import tpu as pltpu

BN_EPS = 1e-5
LANE = 128


def _round_up(x, m):
    return ((x + m - 1) // m) * m


def _pick_group(n_cols):
    """Rows packed per lane-group so output slabs are 128-lane dense."""
    if n_cols >= LANE or LANE % n_cols != 0:
        return 1
    return LANE // n_cols


def _block_diag(b, g):
    """(K, N) -> (g*K, g*N) block-diagonal replication for row-grouped matmul."""
    if g == 1:
        return b
    k, n = b.shape
    eye = jnp.eye(g, dtype=b.dtype)
    return (eye[:, None, :, None] * b[None, :, None, :]).reshape(g * k, g * n)


# ----------------------------- Pallas kernels -----------------------------
def _conv_mm_kernel(*refs, has_in_affine, has_out_affine, has_residual, relu_out):
    """Fused (prologue-affine) @ W (epilogue: affine -> +residual -> relu)."""
    it = iter(refs)
    a_ref = next(it)
    b_ref = next(it)

    a = a_ref[...]
    if has_in_affine:                      # fused pre-norm (1x1 conv only)
        in_s = next(it)
        in_b = next(it)
        a = a.astype(jnp.float32) * in_s[...] + in_b[...]

    acc = jnp.dot(a.astype(jnp.bfloat16), b_ref[...],
                  preferred_element_type=jnp.float32)

    if has_out_affine:                     # fused BatchNorm affine
        out_s = next(it)
        out_b = next(it)
        acc = acc * out_s[...] + out_b[...]
    if has_residual:                       # fused residual add
        res = next(it)
        acc = acc + res[...].astype(jnp.float32)
    if relu_out:                           # fused ReLU
        acc = jnp.maximum(acc, 0.0)

    o_ref = next(it)
    o_ref[...] = acc.astype(o_ref.dtype)


def fused_matmul_pallas(a, b, *, in_scale=None, in_bias=None,
                        out_scale=None, out_bias=None, residual=None,
                        relu_out=False, tm=128):
    """(M, K) @ (K, N) with fused per-column affines / residual / relu.

    Only M is tiled; K and N are full-extent blocks."""
    M, K = a.shape
    K2, N = b.shape
    assert K == K2
    tm = min(tm, _round_up(M, 8))
    Mp = _round_up(M, tm)
    a_p = jnp.pad(a, ((0, Mp - M), (0, 0)))

    inputs = [a_p, b]
    in_specs = [pl.BlockSpec((tm, K), lambda i: (i, 0)),
                pl.BlockSpec((K, N), lambda i: (0, 0))]

    has_in_affine = in_scale is not None
    has_out_affine = out_scale is not None
    has_residual = residual is not None

    if has_in_affine:
        inputs += [in_scale.reshape(1, K).astype(jnp.float32),
                   in_bias.reshape(1, K).astype(jnp.float32)]
        in_specs += [pl.BlockSpec((1, K), lambda i: (0, 0)),
                     pl.BlockSpec((1, K), lambda i: (0, 0))]
    if has_out_affine:
        inputs += [out_scale.reshape(1, N).astype(jnp.float32),
                   out_bias.reshape(1, N).astype(jnp.float32)]
        in_specs += [pl.BlockSpec((1, N), lambda i: (0, 0)),
                     pl.BlockSpec((1, N), lambda i: (0, 0))]
    if has_residual:
        res_p = jnp.pad(residual.astype(jnp.float32), ((0, Mp - M), (0, 0)))
        inputs.append(res_p)
        in_specs.append(pl.BlockSpec((tm, N), lambda i: (i, 0)))

    kernel = functools.partial(_conv_mm_kernel,
                               has_in_affine=has_in_affine,
                               has_out_affine=has_out_affine,
                               has_residual=has_residual,
                               relu_out=relu_out)
    out = pl.pallas_call(
        kernel,
        out_shape=jax.ShapeDtypeStruct((Mp, N), jnp.float32),
        grid_spec=pltpu.PrefetchScalarGridSpec(
            num_scalar_prefetch=0,
            grid=(Mp // tm,),
            in_specs=in_specs,
            out_specs=pl.BlockSpec((tm, N), lambda i: (i, 0))),
        compiler_params=pltpu.CompilerParams(
            dimension_semantics=("parallel",)),
    )(*inputs)
    return out[:M]


def _affine_kernel(x_ref, s_ref, b_ref, o_ref, *, relu):
    y = x_ref[...] * s_ref[...] + b_ref[...]
    if relu:
        y = jnp.maximum(y, 0.0)
    o_ref[...] = y


def affine_pallas(x_nhwc, scale, bias, relu):
    """Per-channel affine (+ optional ReLU), row-grouped to 128 lanes."""
    N, H, W, C = x_nhwc.shape
    M = N * H * W
    x2 = x_nhwc.reshape(M, C)
    g = _pick_group(C)
    Mg_raw = -(-M // g)
    tm = min(256, _round_up(Mg_raw, 8))
    Mg = _round_up(Mg_raw, tm)
    xp = jnp.pad(x2, ((0, Mg * g - M), (0, 0))).reshape(Mg, g * C)
    s = jnp.tile(scale, g).reshape(1, g * C).astype(x2.dtype)
    b = jnp.tile(bias, g).reshape(1, g * C).astype(x2.dtype)
    kernel = functools.partial(_affine_kernel, relu=relu)
    y = pl.pallas_call(
        kernel,
        out_shape=jax.ShapeDtypeStruct((Mg, g * C), x2.dtype),
        grid_spec=pltpu.PrefetchScalarGridSpec(
            num_scalar_prefetch=0,
            grid=(Mg // tm,),
            in_specs=[pl.BlockSpec((tm, g * C), lambda i: (i, 0)),
                      pl.BlockSpec((1, g * C), lambda i: (0, 0)),
                      pl.BlockSpec((1, g * C), lambda i: (0, 0))],
            out_specs=pl.BlockSpec((tm, g * C), lambda i: (i, 0))),
        compiler_params=pltpu.CompilerParams(
            dimension_semantics=("parallel",)),
    )(xp, s, b)
    return y.reshape(Mg * g, C)[:M].reshape(N, H, W, C)


# ----------------------------- conv wrapper -----------------------------
def conv2d_fused(x_nhwc, w_oihw, *, stride=1, padding=0,
                 in_scale=None, in_bias=None,
                 out_scale=None, out_bias=None,
                 residual_nhwc=None, relu_out=False):
    """Conv2d (no bias) via im2col + fused Pallas matmul. Matches PyTorch conv."""
    N, H, W, Cin = x_nhwc.shape
    Cout, Cin2, kh, kw = w_oihw.shape
    assert Cin == Cin2
    # Prologue affine is only valid when there is no zero padding (1x1 convs).
    assert in_scale is None or padding == 0
    Ho = (H + 2 * padding - kh) // stride + 1
    Wo = (W + 2 * padding - kw) // stride + 1
    M = N * Ho * Wo
    K = kh * kw * Cin

    if kh == 1 and kw == 1 and padding == 0:
        A = x_nhwc[:, ::stride, ::stride, :].reshape(M, Cin)
    else:
        # TODO(synk): the 3x3 im2col concat materializes kh*kw shifted views; a
        # lazy per-(dy,dx) DMA path would avoid it but is unnecessary at these sizes.
        xp = jnp.pad(x_nhwc, ((0, 0), (padding, padding), (padding, padding), (0, 0)))
        patches = [xp[:, dy:dy + stride * Ho:stride, dx:dx + stride * Wo:stride, :]
                   for dy in range(kh) for dx in range(kw)]
        A = jnp.concatenate(patches, axis=-1).reshape(M, K)
    A = A.astype(jnp.bfloat16)     # halve HBM traffic of the big operand (MXU is bf16 anyway)

    B = jnp.transpose(w_oihw, (2, 3, 1, 0)).reshape(K, Cout).astype(jnp.bfloat16)

    in_s_k = in_b_k = None
    if in_scale is not None:
        in_s_k = jnp.tile(in_scale, kh * kw)
        in_b_k = jnp.tile(in_bias, kh * kw)

    res2d = None
    if residual_nhwc is not None:
        res2d = residual_nhwc.reshape(M, Cout).astype(jnp.float32)

    # Row-grouping: pack g consecutive output rows into the lane dim so both
    # the output store and the residual load are 128-lane dense.
    g = _pick_group(Cout)
    if g > 1:
        Mp = _round_up(M, g)
        A = jnp.pad(A, ((0, Mp - M), (0, 0))).reshape(Mp // g, g * K)
        B = _block_diag(B, g)
        if in_s_k is not None:
            in_s_k = jnp.tile(in_s_k, g)
            in_b_k = jnp.tile(in_b_k, g)
        if out_scale is not None:
            out_scale = jnp.tile(out_scale, g)
            out_bias = jnp.tile(out_bias, g)
        if res2d is not None:
            res2d = jnp.pad(res2d, ((0, Mp - M), (0, 0))).reshape(Mp // g, g * Cout)
        y = fused_matmul_pallas(A, B, in_scale=in_s_k, in_bias=in_b_k,
                                out_scale=out_scale, out_bias=out_bias,
                                residual=res2d, relu_out=relu_out)
        y = y.reshape(Mp, Cout)[:M]
    else:
        y = fused_matmul_pallas(A, B, in_scale=in_s_k, in_bias=in_b_k,
                                out_scale=out_scale, out_bias=out_bias,
                                residual=res2d, relu_out=relu_out)
    return y.reshape(N, Ho, Wo, Cout)


def bn_scale_bias(bn):
    scale = bn["gamma"] * lax.rsqrt(bn["var"] + BN_EPS)
    bias = bn["beta"] - bn["mean"] * scale
    return scale, bias


# ----------------------------- parameters -----------------------------
def init_bn(key, c):
    k1, k2, k3, k4 = jax.random.split(key, 4)
    return dict(
        gamma=1.0 + 0.1 * jax.random.normal(k1, (c,), jnp.float32),
        beta=0.1 * jax.random.normal(k2, (c,), jnp.float32),
        mean=0.1 * jax.random.normal(k3, (c,), jnp.float32),
        var=jax.random.uniform(k4, (c,), jnp.float32, 0.5, 1.5),
    )


def init_conv(key, cout, cin, kh, kw):
    fan_out = cout * kh * kw
    std = math.sqrt(2.0 / fan_out)
    return std * jax.random.normal(key, (cout, cin, kh, kw), jnp.float32)


def init_basic_block(key, *, pre_activation, channels_in, channels_out, stride):
    keys = jax.random.split(key, 6)
    p = dict(pre_activation=pre_activation, stride=stride,
             conv1=init_conv(keys[0], channels_out, channels_in, 3, 3),
             conv2=init_conv(keys[1], channels_out, channels_out, 3, 3),
             downsample=None)
    p["norm1"] = init_bn(keys[2], channels_in if pre_activation else channels_out)
    p["norm2"] = init_bn(keys[3], channels_out)
    if stride != 1 or channels_in != channels_out:
        ds_norm_c = channels_in if pre_activation else channels_out
        p["downsample"] = dict(norm=init_bn(keys[4], ds_norm_c),
                               conv=init_conv(keys[5], channels_out, channels_in, 1, 1))
    return p


# ----------------------------- forward -----------------------------
def basic_block_forward(params, x_nchw):
    """BasicBlock.forward (eval mode). Input/output are PyTorch-style NCHW."""
    x = jnp.transpose(x_nchw, (0, 2, 3, 1)).astype(jnp.float32)   # NCHW -> NHWC
    stride = params["stride"]

    if params["pre_activation"]:
        # out = conv1(act1(norm1(x)))  with norm2+act2 fused into conv1 epilogue
        s1, b1 = bn_scale_bias(params["norm1"])
        x_act = affine_pallas(x, s1, b1, relu=True)      # feeds zero-padded 3x3

        if params["downsample"] is not None:
            ds = params["downsample"]
            s_ds, b_ds = bn_scale_bias(ds["norm"])        # norm -> conv1x1
            identity = conv2d_fused(x, ds["conv"], stride=stride, padding=0,
                                    in_scale=s_ds, in_bias=b_ds)
        else:
            identity = x

        s2, b2 = bn_scale_bias(params["norm2"])
        h = conv2d_fused(x_act, params["conv1"], stride=stride, padding=1,
                         out_scale=s2, out_bias=b2, relu_out=True)
        # TODO(synk): dropout (p=0.0) and residual_scale (skip_init=False) are
        # identity in this configuration, so they are omitted.
        out = conv2d_fused(h, params["conv2"], stride=1, padding=1,
                           residual_nhwc=identity)        # residual add fused
    else:
        # v1: conv1 -> norm1 -> relu ; conv2 -> norm2 ; +identity ; relu
        s1, b1 = bn_scale_bias(params["norm1"])
        h = conv2d_fused(x, params["conv1"], stride=stride, padding=1,
                         out_scale=s1, out_bias=b1, relu_out=True)

        if params["downsample"] is not None:
            ds = params["downsample"]
            s_ds, b_ds = bn_scale_bias(ds["norm"])        # conv1x1 -> norm
            identity = conv2d_fused(x, ds["conv"], stride=stride, padding=0,
                                    out_scale=s_ds, out_bias=b_ds)
        else:
            identity = x

        s2, b2 = bn_scale_bias(params["norm2"])
        out = conv2d_fused(h, params["conv2"], stride=1, padding=1,
                           out_scale=s2, out_bias=b2,
                           residual_nhwc=identity, relu_out=True)

    return jnp.transpose(out, (0, 3, 1, 2))               # NHWC -> NCHW


# ----------------------------- pure-JAX reference -----------------------------
def _bn_ref(x_nhwc, bn):
    s, b = bn_scale_bias(bn)
    return x_nhwc * s + b


def _conv_ref(x_nhwc, w_oihw, stride, padding):
    return lax.conv_general_dilated(
        x_nhwc, jnp.transpose(w_oihw, (2, 3, 1, 0)),
        window_strides=(stride, stride),
        padding=[(padding, padding), (padding, padding)],
        dimension_numbers=("NHWC", "HWIO", "NHWC"),
        precision=lax.Precision.HIGHEST)


def basic_block_reference(params, x_nchw):
    x = jnp.transpose(x_nchw, (0, 2, 3, 1)).astype(jnp.float32)
    stride = params["stride"]
    if params["pre_activation"]:
        out = jax.nn.relu(_bn_ref(x, params["norm1"]))
        out = _conv_ref(out, params["conv1"], stride, 1)
        out = jax.nn.relu(_bn_ref(out, params["norm2"]))
        out = _conv_ref(out, params["conv2"], 1, 1)
        if params["downsample"] is not None:
            identity = _conv_ref(_bn_ref(x, params["downsample"]["norm"]),
                                 params["downsample"]["conv"], stride, 0)
        else:
            identity = x
        out = out + identity
    else:
        out = jax.nn.relu(_bn_ref(_conv_ref(x, params["conv1"], stride, 1),
                                  params["norm1"]))
        out = _bn_ref(_conv_ref(out, params["conv2"], 1, 1), params["norm2"])
        if params["downsample"] is not None:
            identity = _bn_ref(_conv_ref(x, params["downsample"]["conv"], stride, 0),
                               params["downsample"]["norm"])
        else:
            identity = x
        out = jax.nn.relu(out + identity)
    return jnp.transpose(out, (0, 3, 1, 2))


# ----------------------------- main -----------------------------
if __name__ == "__main__":
    key = jax.random.PRNGKey(0)
    kx, kp1, kp2 = jax.random.split(key, 3)
    x = jax.random.normal(kx, (2, 4, 16, 16), jnp.float32)   # NCHW, like PyTorch

    # pre-activation BasicBlock with channel change + stride (downsample path)
    blk_pre = init_basic_block(kp1, pre_activation=True,
                               channels_in=4, channels_out=8, stride=2)
    fwd_pre = jax.jit(functools.partial(basic_block_forward, blk_pre))
    y_pre = jax.block_until_ready(fwd_pre(x))
    assert y_pre.shape == (2, 8, 8, 8)
    assert bool(jnp.all(jnp.isfinite(y_pre)))
    err_pre = float(jnp.max(jnp.abs(y_pre - basic_block_reference(blk_pre, x))))
    assert err_pre < 2e-1, f"pre-activation mismatch vs reference: {err_pre}"

    # classic (v1) BasicBlock with identity skip
    blk_v1 = init_basic_block(kp2, pre_activation=False,
                              channels_in=4, channels_out=4, stride=1)
    fwd_v1 = jax.jit(functools.partial(basic_block_forward, blk_v1))
    y_v1 = jax.block_until_ready(fwd_v1(x))
    assert y_v1.shape == (2, 4, 16, 16)
    assert bool(jnp.all(jnp.isfinite(y_v1)))
    err_v1 = float(jnp.max(jnp.abs(y_v1 - basic_block_reference(blk_v1, x))))
    assert err_v1 < 2e-1, f"v1 mismatch vs reference: {err_v1}"

    print("KERNEL_OK")
</pallas_src>

<mosaic_0001>
module attributes {stable_mosaic.version = 11 : i64} {
  func.func @_affine_kernel(%arg0: i32, %arg1: memref<16x128xf32, #tpu.memory_space<vmem>>, %arg2: memref<1x128xf32, #tpu.memory_space<vmem>>, %arg3: memref<1x128xf32, #tpu.memory_space<vmem>>, %arg4: memref<16x128xf32, #tpu.memory_space<vmem>>) attributes {dimension_semantics = [#tpu.dimension_semantics<parallel>], iteration_bounds = array<i64: 1>, scalar_prefetch = 0 : i64, scratch_operands = 0 : i64, tpu.core_type = #tpu.core_type<tc>, window_params = [{transform_indices = @transform_0, window_bounds = array<i64: 16, 128>}, {pipeline_mode = #tpu.pipeline_mode<synchronous>, transform_indices = @transform_1, window_bounds = array<i64: 1, 128>}, {pipeline_mode = #tpu.pipeline_mode<synchronous>, transform_indices = @transform_2, window_bounds = array<i64: 1, 128>}, {transform_indices = @transform_3, window_bounds = array<i64: 16, 128>}]} {
    %c0 = arith.constant 0 : index
    %c0_0 = arith.constant 0 : index
    %0 = vector.load %arg1[%c0, %c0_0] : memref<16x128xf32, #tpu.memory_space<vmem>>, vector<16x128xf32>
    %c0_1 = arith.constant 0 : index
    %c0_2 = arith.constant 0 : index
    %1 = vector.load %arg2[%c0_1, %c0_2] : memref<1x128xf32, #tpu.memory_space<vmem>>, vector<1x128xf32>
    %2 = vector.broadcast %1 : vector<1x128xf32> to vector<16x128xf32>
    %3 = arith.mulf %0, %2 : vector<16x128xf32>
    %c0_3 = arith.constant 0 : index
    %c0_4 = arith.constant 0 : index
    %4 = vector.load %arg3[%c0_3, %c0_4] : memref<1x128xf32, #tpu.memory_space<vmem>>, vector<1x128xf32>
    %5 = vector.broadcast %4 : vector<1x128xf32> to vector<16x128xf32>
    %6 = arith.addf %3, %5 : vector<16x128xf32>
    %cst = arith.constant 0.000000e+00 : f32
    %7 = vector.broadcast %cst : f32 to vector<16x128xf32>
    %8 = arith.maximumf %6, %7 : vector<16x128xf32>
    %c0_5 = arith.constant 0 : index
    %c0_6 = arith.constant 0 : index
    %9 = vector.load %arg4[%c0_5, %c0_6] : memref<16x128xf32, #tpu.memory_space<vmem>>, vector<16x128xf32>
    tpu.vector_store %arg4[%c0_5, %c0_6], %8 {strides = array<i32>} : memref<16x128xf32, #tpu.memory_space<vmem>>, vector<16x128xf32>,
    return
  }
  func.func @transform_0(%arg0: i32) -> (i32, i32) {
    %c0_i32 = arith.constant 0 : i32
    %c0_i32_0 = arith.constant 0 : i32
    return %arg0, %c0_i32 : i32, i32
  }
  func.func @transform_1(%arg0: i32) -> (i32, i32) {
    %c0_i32 = arith.constant 0 : i32
    %c0_i32_0 = arith.constant 0 : i32
    %c0_i32_1 = arith.constant 0 : i32
    return %c0_i32, %c0_i32_0 : i32, i32
  }
  func.func @transform_2(%arg0: i32) -> (i32, i32) {
    %c0_i32 = arith.constant 0 : i32
    %c0_i32_0 = arith.constant 0 : i32
    %c0_i32_1 = arith.constant 0 : i32
    return %c0_i32, %c0_i32_0 : i32, i32
  }
  func.func @transform_3(%arg0: i32) -> (i32, i32) {
    %c0_i32 = arith.constant 0 : i32
    %c0_i32_0 = arith.constant 0 : i32
    return %arg0, %c0_i32 : i32, i32
  }
}

module attributes {stable_mosaic.version = 11 : i64} {
  func.func @_conv_mm_kernel(%arg0: i32, %arg1: memref<8x576xbf16, #tpu.memory_space<vmem>>, %arg2: memref<576x128xbf16, #tpu.memory_space<vmem>>, %arg3: memref<1x128xf32, #tpu.memory_space<vmem>>, %arg4: memref<1x128xf32, #tpu.memory_space<vmem>>, %arg5: memref<8x128xf32, #tpu.memory_space<vmem>>) attributes {dimension_semantics = [#tpu.dimension_semantics<parallel>], iteration_bounds = array<i64: 1>, scalar_prefetch = 0 : i64, scratch_operands = 0 : i64, tpu.core_type = #tpu.core_type<tc>, window_params = [{transform_indices = @transform_0, window_bounds = array<i64: 8, 576>}, {pipeline_mode = #tpu.pipeline_mode<synchronous>, transform_indices = @transform_1, window_bounds = array<i64: 576, 128>}, {pipeline_mode = #tpu.pipeline_mode<synchronous>, transform_indices = @transform_2, window_bounds = array<i64: 1, 128>}, {pipeline_mode = #tpu.pipeline_mode<synchronous>, transform_indices = @transform_3, window_bounds = array<i64: 1, 128>}, {transform_indices = @transform_4, window_bounds = array<i64: 8, 128>}]} {
    %c0 = arith.constant 0 : index
    %c0_0 = arith.constant 0 : index
    %0 = vector.load %arg1[%c0, %c0_0] : memref<8x576xbf16, #tpu.memory_space<vmem>>, vector<8x576xbf16>
    %c0_1 = arith.constant 0 : index
    %c0_2 = arith.constant 0 : index
    %1 = vector.load %arg2[%c0_1, %c0_2] : memref<576x128xbf16, #tpu.memory_space<vmem>>, vector<576x128xbf16>
    %cst = arith.constant dense<0.000000e+00> : vector<8x128xf32>
    %2 = tpu.matmul %0, %1, %cst {dimension_numbers = #tpu.dot_dimension_numbers<[1], [0], [0], [1], [0, 0, 1, 1], [], []>} : vector<8x576xbf16>, vector<576x128xbf16>, vector<8x128xf32> -> vector<8x128xf32>
    %c0_3 = arith.constant 0 : index
    %c0_4 = arith.constant 0 : index
    %3 = vector.load %arg3[%c0_3, %c0_4] : memref<1x128xf32, #tpu.memory_space<vmem>>, vector<1x128xf32>
    %4 = vector.broadcast %3 : vector<1x128xf32> to vector<8x128xf32>
    %5 = arith.mulf %2, %4 : vector<8x128xf32>
    %c0_5 = arith.constant 0 : index
    %c0_6 = arith.constant 0 : index
    %6 = vector.load %arg4[%c0_5, %c0_6] : memref<1x128xf32, #tpu.memory_space<vmem>>, vector<1x128xf32>
    %7 = vector.broadcast %6 : vector<1x128xf32> to vector<8x128xf32>
    %8 = arith.addf %5, %7 : vector<8x128xf32>
    %cst_7 = arith.constant 0.000000e+00 : f32
    %9 = vector.broadcast %cst_7 : f32 to vector<8x128xf32>
    %10 = arith.maximumf %8, %9 : vector<8x128xf32>
    %c0_8 = arith.constant 0 : index
    %c0_9 = arith.constant 0 : index
    %11 = vector.load %arg5[%c0_8, %c0_9] : memref<8x128xf32, #tpu.memory_space<vmem>>, vector<8x128xf32>
    tpu.vector_store %arg5[%c0_8, %c0_9], %10 {strides = array<i32>} : memref<8x128xf32, #tpu.memory_space<vmem>>, vector<8x128xf32>,
    return
  }
  func.func @transform_0(%arg0: i32) -> (i32, i32) {
    %c0_i32 = arith.constant 0 : i32
    %c0_i32_0 = arith.constant 0 : i32
    return %arg0, %c0_i32 : i32, i32
  }
  func.func @transform_1(%arg0: i32) -> (i32, i32) {
    %c0_i32 = arith.constant 0 : i32
    %c0_i32_0 = arith.constant 0 : i32
    %c0_i32_1 = arith.constant 0 : i32
    return %c0_i32, %c0_i32_0 : i32, i32
  }
  func.func @transform_2(%arg0: i32) -> (i32, i32) {
    %c0_i32 = arith.constant 0 : i32
    %c0_i32_0 = arith.constant 0 : i32
    %c0_i32_1 = arith.constant 0 : i32
    return %c0_i32, %c0_i32_0 : i32, i32
  }
  func.func @transform_3(%arg0: i32) -> (i32, i32) {
    %c0_i32 = arith.constant 0 : i32
    %c0_i32_0 = arith.constant 0 : i32
    %c0_i32_1 = arith.constant 0 : i32
    return %c0_i32, %c0_i32_0 : i32, i32
  }
  func.func @transform_4(%arg0: i32) -> (i32, i32) {
    %c0_i32 = arith.constant 0 : i32
    %c0_i32_0 = arith.constant 0 : i32
    return %arg0, %c0_i32 : i32, i32
  }
}

module attributes {stable_mosaic.version = 11 : i64} {
  func.func @_conv_mm_kernel(%arg0: i32, %arg1: memref<8x64xbf16, #tpu.memory_space<vmem>>, %arg2: memref<64x128xbf16, #tpu.memory_space<vmem>>, %arg3: memref<1x64xf32, #tpu.memory_space<vmem>>, %arg4: memref<1x64xf32, #tpu.memory_space<vmem>>, %arg5: memref<8x128xf32, #tpu.memory_space<vmem>>) attributes {dimension_semantics = [#tpu.dimension_semantics<parallel>], iteration_bounds = array<i64: 1>, scalar_prefetch = 0 : i64, scratch_operands = 0 : i64, tpu.core_type = #tpu.core_type<tc>, window_params = [{transform_indices = @transform_0, window_bounds = array<i64: 8, 64>}, {pipeline_mode = #tpu.pipeline_mode<synchronous>, transform_indices = @transform_1, window_bounds = array<i64: 64, 128>}, {pipeline_mode = #tpu.pipeline_mode<synchronous>, transform_indices = @transform_2, window_bounds = array<i64: 1, 64>}, {pipeline_mode = #tpu.pipeline_mode<synchronous>, transform_indices = @transform_3, window_bounds = array<i64: 1, 64>}, {transform_indices = @transform_4, window_bounds = array<i64: 8, 128>}]} {
    %c0 = arith.constant 0 : index
    %c0_0 = arith.constant 0 : index
    %0 = vector.load %arg1[%c0, %c0_0] : memref<8x64xbf16, #tpu.memory_space<vmem>>, vector<8x64xbf16>
    %1 = arith.extf %0 : vector<8x64xbf16> to vector<8x64xf32>
    %c0_1 = arith.constant 0 : index
    %c0_2 = arith.constant 0 : index
    %2 = vector.load %arg3[%c0_1, %c0_2] : memref<1x64xf32, #tpu.memory_space<vmem>>, vector<1x64xf32>
    %3 = vector.broadcast %2 : vector<1x64xf32> to vector<8x64xf32>
    %4 = arith.mulf %1, %3 : vector<8x64xf32>
    %c0_3 = arith.constant 0 : index
    %c0_4 = arith.constant 0 : index
    %5 = vector.load %arg4[%c0_3, %c0_4] : memref<1x64xf32, #tpu.memory_space<vmem>>, vector<1x64xf32>
    %6 = vector.broadcast %5 : vector<1x64xf32> to vector<8x64xf32>
    %7 = arith.addf %4, %6 : vector<8x64xf32>
    %8 = arith.truncf %7 : vector<8x64xf32> to vector<8x64xbf16>
    %c0_5 = arith.constant 0 : index
    %c0_6 = arith.constant 0 : index
    %9 = vector.load %arg2[%c0_5, %c0_6] : memref<64x128xbf16, #tpu.memory_space<vmem>>, vector<64x128xbf16>
    %cst = arith.constant dense<0.000000e+00> : vector<8x128xf32>
    %10 = tpu.matmul %8, %9, %cst {dimension_numbers = #tpu.dot_dimension_numbers<[1], [0], [0], [1], [0, 0, 1, 1], [], []>} : vector<8x64xbf16>, vector<64x128xbf16>, vector<8x128xf32> -> vector<8x128xf32>
    %c0_7 = arith.constant 0 : index
    %c0_8 = arith.constant 0 : index
    %11 = vector.load %arg5[%c0_7, %c0_8] : memref<8x128xf32, #tpu.memory_space<vmem>>, vector<8x128xf32>
    tpu.vector_store %arg5[%c0_7, %c0_8], %10 {strides = array<i32>} : memref<8x128xf32, #tpu.memory_space<vmem>>, vector<8x128xf32>,
    return
  }
  func.func @transform_0(%arg0: i32) -> (i32, i32) {
    %c0_i32 = arith.constant 0 : i32
    %c0_i32_0 = arith.constant 0 : i32
    return %arg0, %c0_i32 : i32, i32
  }
  func.func @transform_1(%arg0: i32) -> (i32, i32) {
    %c0_i32 = arith.constant 0 : i32
    %c0_i32_0 = arith.constant 0 : i32
    %c0_i32_1 = arith.constant 0 : i32
    return %c0_i32, %c0_i32_0 : i32, i32
  }
  func.func @transform_2(%arg0: i32) -> (i32, i32) {
    %c0_i32 = arith.constant 0 : i32
    %c0_i32_0 = arith.constant 0 : i32
    %c0_i32_1 = arith.constant 0 : i32
    return %c0_i32, %c0_i32_0 : i32, i32
  }
  func.func @transform_3(%arg0: i32) -> (i32, i32) {
    %c0_i32 = arith.constant 0 : i32
    %c0_i32_0 = arith.constant 0 : i32
    %c0_i32_1 = arith.constant 0 : i32
    return %c0_i32, %c0_i32_0 : i32, i32
  }
  func.func @transform_4(%arg0: i32) -> (i32, i32) {
    %c0_i32 = arith.constant 0 : i32
    %c0_i32_0 = arith.constant 0 : i32
    return %arg0, %c0_i32 : i32, i32
  }
}

module attributes {stable_mosaic.version = 11 : i64} {
  func.func @_conv_mm_kernel(%arg0: i32, %arg1: memref<8x1152xbf16, #tpu.memory_space<vmem>>, %arg2: memref<1152x128xbf16, #tpu.memory_space<vmem>>, %arg3: memref<8x128xf32, #tpu.memory_space<vmem>>, %arg4: memref<8x128xf32, #tpu.memory_space<vmem>>) attributes {dimension_semantics = [#tpu.dimension_semantics<parallel>], iteration_bounds = array<i64: 1>, scalar_prefetch = 0 : i64, scratch_operands = 0 : i64, tpu.core_type = #tpu.core_type<tc>, window_params = [{transform_indices = @transform_0, window_bounds = array<i64: 8, 1152>}, {pipeline_mode = #tpu.pipeline_mode<synchronous>, transform_indices = @transform_1, window_bounds = array<i64: 1152, 128>}, {transform_indices = @transform_2, window_bounds = array<i64: 8, 128>}, {transform_indices = @transform_3, window_bounds = array<i64: 8, 128>}]} {
    %c0 = arith.constant 0 : index
    %c0_0 = arith.constant 0 : index
    %0 = vector.load %arg1[%c0, %c0_0] : memref<8x1152xbf16, #tpu.memory_space<vmem>>, vector<8x1152xbf16>
    %c0_1 = arith.constant 0 : index
    %c0_2 = arith.constant 0 : index
    %1 = vector.load %arg2[%c0_1, %c0_2] : memref<1152x128xbf16, #tpu.memory_space<vmem>>, vector<1152x128xbf16>
    %cst = arith.constant dense<0.000000e+00> : vector<8x128xf32>
    %2 = tpu.matmul %0, %1, %cst {dimension_numbers = #tpu.dot_dimension_numbers<[1], [0], [0], [1], [0, 0, 1, 1], [], []>} : vector<8x1152xbf16>, vector<1152x128xbf16>, vector<8x128xf32> -> vector<8x128xf32>
    %c0_3 = arith.constant 0 : index
    %c0_4 = arith.constant 0 : index
    %3 = vector.load %arg3[%c0_3, %c0_4] : memref<8x128xf32, #tpu.memory_space<vmem>>, vector<8x128xf32>
    %4 = arith.addf %2, %3 : vector<8x128xf32>
    %c0_5 = arith.constant 0 : index
    %c0_6 = arith.constant 0 : index
    %5 = vector.load %arg4[%c0_5, %c0_6] : memref<8x128xf32, #tpu.memory_space<vmem>>, vector<8x128xf32>
    tpu.vector_store %arg4[%c0_5, %c0_6], %4 {strides = array<i32>} : memref<8x128xf32, #tpu.memory_space<vmem>>, vector<8x128xf32>,
    return
  }
  func.func @transform_0(%arg0: i32) -> (i32, i32) {
    %c0_i32 = arith.constant 0 : i32
    %c0_i32_0 = arith.constant 0 : i32
    return %arg0, %c0_i32 : i32, i32
  }
  func.func @transform_1(%arg0: i32) -> (i32, i32) {
    %c0_i32 = arith.constant 0 : i32
    %c0_i32_0 = arith.constant 0 : i32
    %c0_i32_1 = arith.constant 0 : i32
    return %c0_i32, %c0_i32_0 : i32, i32
  }
  func.func @transform_2(%arg0: i32) -> (i32, i32) {
    %c0_i32 = arith.constant 0 : i32
    %c0_i32_0 = arith.constant 0 : i32
    return %arg0, %c0_i32 : i32, i32
  }
  func.func @transform_3(%arg0: i32) -> (i32, i32) {
    %c0_i32 = arith.constant 0 : i32
    %c0_i32_0 = arith.constant 0 : i32
    return %arg0, %c0_i32 : i32, i32
  }
}

</mosaic_0001>

<bundles_post_ra>
// kernel: tile.26
= control target key start
LH: loop header
LB: loop body
LE: loop exit
PB: predicated region body
PF: predicated region fallthrough
CT: control target
= control target key end

     0   :  { %s40_s0 = inlined_call_operand.vmem [shape: f32[4], index: 0, kind: input, shape index: {}]   ;;  %s41_s1 = inlined_call_operand.vmem [shape: f32[32,4], index: 1, kind: output, shape index: {}]  }
   0x1   :  { %v4_v0 = vld [vmem:[%s40_s0] ss:$0 sm:$0xff] }
   0x2   :  { %5 = vst [vmem:[%s41_s1] sm:$0xff] %v4_v0  ;;  %12 = vst [vmem:[%s41_s1 + $0x8] sm:$0xff] %v4_v0 }
   0x3   :  { %13 = vst [vmem:[%s41_s1 + $0x10] sm:$0xff] %v4_v0  ;;  %14 = vst [vmem:[%s41_s1 + $0x18] sm:$0xff] %v4_v0 }

// kernel: tile.27
= control target key start
LH: loop header
LB: loop body
LE: loop exit
PB: predicated region body
PF: predicated region fallthrough
CT: control target
= control target key end

     0   :  { %s259_s10 = smov 124   ;;  %s260_s11 = smov 116   ;;  %vm3_vm0 = vcmask 31744   ;;  %vm9_vm1 = vcmask 1048544   ;;  %vm15_vm2 = vcmask 1015744   ;;  %vm21_vm3 = vcmask 982944   ;;  %s399_s0 = inlined_call_operand.vmem [shape: f32[32,4], index: 0, kind: input, shape index: {}]   ;;  %s400_s1 = inlined_call_operand.vmem [shape: f32[1,128], index: 1, kind: output, shape index: {}]  }
   0x1   :  { %v197_v0 = vld [vmem:[%s399_s0 + $0x1f] sm:$0x1]   ;;  %v199_v1 = vld [vmem:[%s399_s0 + $0x1d] sm:$0x1]   ;;  %v198_v2 = vld [vmem:[%s399_s0 + $0x1e] sm:$0x1]  }
   0x2   :  { %7 = vrot.lane.b32.xlu0 %v197_v0, %s259_s10  ;;  %19 = vrot.lane.b32.xlu1 %v199_v1, %s260_s11  ;;  %v200_v3 = vld [vmem:[%s399_s0 + $0x1c] sm:$0x1]   ;;  %s261_s16 = smov 120   ;;  %s262_s17 = smov 112   ;;  %v201_v4 = vld [vmem:[%s399_s0 + $0x1b] sm:$0x1]  }
   0x3   :  { %v202_v5 = vld [vmem:[%s399_s0 + $0x1a] sm:$0x1]   ;;  %s263_s22 = smov 108   ;;  %s264_s23 = smov 104   ;;  %v203_v6 = vld [vmem:[%s399_s0 + $0x19] sm:$0x1]  }
   0x4   :  { %v204_v7 = vld [vmem:[%s399_s0 + $0x18] sm:$0x1]   ;;  %s265_s28 = smov 100   ;;  %s266_s29 = smov 96   ;;  %v205_v8 = vld [vmem:[%s399_s0 + $0x17] sm:$0x1]  }
   0x5   :  { %v206_v9 = vld [vmem:[%s399_s0 + $0x16] sm:$0x1]   ;;  %v2_v10 = vld [vmem:[%s399_s0] sm:$0x1]   ;;  %s267_s7 = smov 92   ;;  %s268_s8 = smov 88  }
   0x6   :  { %13 = vrot.lane.b32.xlu0 %v198_v2, %s261_s16  ;;  %25 = vrot.lane.b32.xlu1 %v200_v3, %s262_s17  ;;  %4 = vst.msk [vmem:[#allocation0] sm:$0x1] %vm3_vm0, %v2_v10   ;;  %v207_v11 = vld [vmem:[%s399_s0 + $0x15] sm:$0x1]   ;;  %v208_v12 = vld [vmem:[%s399_s0 + $0x14] sm:$0x1]  }
   0x7   :  { %s269_s13 = smov 84   ;;  %s270_s14 = smov 80   ;;  %v209_v13 = vld [vmem:[%s399_s0 + $0x13] sm:$0x1]   ;;  %v210_v14 = vld [vmem:[%s399_s0 + $0x12] sm:$0x1]  }
   0x8   :  { %s271_s19 = smov 76   ;;  %s272_s20 = smov 72   ;;  %v211_v15 = vld [vmem:[%s399_s0 + $0x11] sm:$0x1]   ;;  %v212_v16 = vld [vmem:[%s399_s0 + $0x10] sm:$0x1]  }
   0x9   :  { %s273_s25 = smov 68   ;;  %s274_s26 = smov 64   ;;  %v213_v17 = vld [vmem:[%s399_s0 + $0xf] sm:$0x1]   ;;  %v214_v18 = vld [vmem:[%s399_s0 + $0xe] sm:$0x1]  }
   0xa   :  { %31 = vrot.lane.b32.xlu0 %v201_v4, %s263_s22  ;;  %37 = vrot.lane.b32.xlu1 %v202_v5, %s264_s23  ;;  %s275_s2 = smov 60   ;;  %s276_s3 = smov 56   ;;  %v215_v19 = vld [vmem:[%s399_s0 + $0xd] sm:$0x1]   ;;  %v216_v20 = vld [vmem:[%s399_s0 + $0xc] sm:$0x1]  }
   0xb   :  { %s278_s9 = smov 48   ;;  %v217_v21 = vld [vmem:[%s399_s0 + $0xb] sm:$0x1]   ;;  %v218_v22 = vld [vmem:[%s399_s0 + $0xa] sm:$0x1]   ;;  %s280_s15 = smov 40  }
   0xc   :  { %v219_v23 = vld [vmem:[%s399_s0 + $0x9] sm:$0x1]   ;;  %v220_v24 = vld [vmem:[%s399_s0 + $0x8] sm:$0x1]   ;;  %s282_s21 = smov 32   ;;  %s284_s27 = smov 24  }
   0xd   :  { %v221_v25 = vld [vmem:[%s399_s0 + $0x7] sm:$0x1]   ;;  %v222_v26 = vld [vmem:[%s399_s0 + $0x6] sm:$0x1]   ;;  %v223_v27 = vld [vmem:[%s399_s0 + $0x5] sm:$0x1]  }
   0xe   :  { %43 = vrot.lane.b32.xlu0 %v203_v6, %s265_s28  ;;  %49 = vrot.lane.b32.xlu1 %v204_v7, %s266_s29  ;;  %v224_v28 = vld [vmem:[%s399_s0 + $0x4] sm:$0x1]   ;;  %s286_s4 = smov 16   ;;  %v225_v29 = vld [vmem:[%s399_s0 + $0x3] sm:$0x1]   ;;  %s288_s10 = smov 8  }
   0xf   :  { %v226_v30 = vld [vmem:[%s399_s0 + $0x2] sm:$0x1]   ;;  %v227_v31 = vld [vmem:[%s399_s0 + $0x1] sm:$0x1]   ;;  %s289_s0 = smov 4   ;;  %vm27_vm4 = vcmask 950144  }
  0x10   :  { %vm33_vm5 = vcmask 917344   ;;  %vm39_vm6 = vcmask 884544   ;;  %vm45_vm7 = vcmask 851744   ;;  %vm51_vm8 = vcmask 818944  }
  0x11   :  { %vm57_vm9 = vcmask 786144   ;;  %vm63_vm10 = vcmask 753344   ;;  %vm69_vm11 = vcmask 720544   ;;  %vm75_vm12 = vcmask 687744  }
  0x12   :  { %55 = vrot.lane.b32.xlu0 %v205_v8, %s267_s7  ;;  %61 = vrot.lane.b32.xlu1 %v206_v9, %s268_s8  ;;  %s277_s8 = smov 52   ;;  %vm81_vm13 = vcmask 654944   ;;  %vm87_vm14 = vcmask 622144   ;;  %vm93_vm15 = vcmask 589344   ;;  %vm99_vm0 = vcmask 556544  }
  0x16   :  { %67 = vrot.lane.b32.xlu0 %v207_v11, %s269_s13  ;;  %73 = vrot.lane.b32.xlu1 %v208_v12, %s270_s14  ;;  %s279_s14 = smov 44  }
  0x1a   :  { %79 = vrot.lane.b32.xlu0 %v209_v13, %s271_s19  ;;  %85 = vrot.lane.b32.xlu1 %v210_v14, %s272_s20  ;;  %s281_s20 = smov 36  }
  0x1e   :  { %91 = vrot.lane.b32.xlu0 %v211_v15, %s273_s25  ;;  %97 = vrot.lane.b32.xlu1 %v212_v16, %s274_s26  ;;  %s283_s26 = smov 28  }
  0x22   :  { %103 = vrot.lane.b32.xlu0 %v213_v17, %s275_s2  ;;  %109 = vrot.lane.b32.xlu1 %v214_v18, %s276_s3  ;;  %s285_s3 = smov 20  }
  0x26   :  { %115 = vrot.lane.b32.xlu0 %v215_v19, %s277_s8  ;;  %121 = vrot.lane.b32.xlu1 %v216_v20, %s278_s9  ;;  %s287_s9 = smov 12  }
  0x2a   :  { %127 = vrot.lane.b32.xlu0 %v217_v21, %s279_s14  ;;  %133 = vrot.lane.b32.xlu1 %v218_v22, %s280_s15 }
  0x2e   :  { %139 = vrot.lane.b32.xlu0 %v219_v23, %s281_s20  ;;  %145 = vrot.lane.b32.xlu1 %v220_v24, %s282_s21 }
  0x32   :  { %151 = vrot.lane.b32.xlu0 %v221_v25, %s283_s26  ;;  %157 = vrot.lane.b32.xlu1 %v222_v26, %s284_s27 }
  0x36   :  { %163 = vrot.lane.b32.xlu0 %v223_v27, %s285_s3  ;;  %169 = vrot.lane.b32.xlu1 %v224_v28, %s286_s4 }
  0x3a   :  { %175 = vrot.lane.b32.xlu0 %v225_v29, %s287_s9  ;;  %181 = vrot.lane.b32.xlu1 %v226_v30, %s288_s10 }
  0x3e   :  { %187 = vrot.lane.b32.xlu0 %v227_v31, %s289_s0 }
  0x74   :  { %v8_v32 = vpop.permute.xlu0 %7   ;;  %v20_v33 = vpop.permute.xlu1 %19  }
  0x75   :  { %10 = vst.msk [vmem:[#allocation0] sm:$0x1] %vm9_vm1, %v8_v32   ;;  %vm105_vm1 = vcmask 523744  }
  0x78   :  { %v14_v34 = vpop.permute.xlu0 %13   ;;  %v26_v35 = vpop.permute.xlu1 %25  }
  0x79   :  { %16 = vst.msk [vmem:[#allocation0] sm:$0x1] %vm15_vm2, %v14_v34   ;;  %vm111_vm2 = vcmask 490944  }
  0x7a   :  { %22 = vst.msk [vmem:[#allocation0] sm:$0x1] %vm21_vm3, %v20_v33   ;;  %vm117_vm3 = vcmask 458144  }
  0x7b   :  { %28 = vst.msk [vmem:[#allocation0] sm:$0x1] %vm27_vm4, %v26_v35   ;;  %vm123_vm4 = vcmask 425344  }
  0x7c   :  { %v32_v36 = vpop.permute.xlu0 %31   ;;  %v38_v37 = vpop.permute.xlu1 %37  }
  0x7d   :  { %34 = vst.msk [vmem:[#allocation0] sm:$0x1] %vm33_vm5, %v32_v36   ;;  %vm129_vm5 = vcmask 392544  }
  0x7e   :  { %40 = vst.msk [vmem:[#allocation0] sm:$0x1] %vm39_vm6, %v38_v37   ;;  %vm135_vm6 = vcmask 359744  }
  0x80   :  { %v44_v38 = vpop.permute.xlu0 %43   ;;  %v50_v39 = vpop.permute.xlu1 %49  }
  0x81   :  { %46 = vst.msk [vmem:[#allocation0] sm:$0x1] %vm45_vm7, %v44_v38   ;;  %vm141_vm7 = vcmask 326944  }
  0x82   :  { %52 = vst.msk [vmem:[#allocation0] sm:$0x1] %vm51_vm8, %v50_v39   ;;  %vm147_vm8 = vcmask 294144  }
  0x84   :  { %v56_v40 = vpop.permute.xlu0 %55   ;;  %v62_v41 = vpop.permute.xlu1 %61  }
  0x85   :  { %58 = vst.msk [vmem:[#allocation0] sm:$0x1] %vm57_vm9, %v56_v40   ;;  %vm153_vm9 = vcmask 261344  }
  0x86   :  { %64 = vst.msk [vmem:[#allocation0] sm:$0x1] %vm63_vm10, %v62_v41   ;;  %vm159_vm10 = vcmask 228544  }
  0x88   :  { %v68_v42 = vpop.permute.xlu0 %67   ;;  %v74_v43 = vpop.permute.xlu1 %73  }
  0x89   :  { %70 = vst.msk [vmem:[#allocation0] sm:$0x1] %vm69_vm11, %v68_v42   ;;  %vm165_vm11 = vcmask 195744  }
  0x8a   :  { %76 = vst.msk [vmem:[#allocation0] sm:$0x1] %vm75_vm12, %v74_v43   ;;  %vm171_vm12 = vcmask 162944  }
  0x8c   :  { %v80_v44 = vpop.permute.xlu0 %79   ;;  %v86_v45 = vpop.permute.xlu1 %85  }
  0x8d   :  { %82 = vst.msk [vmem:[#allocation0] sm:$0x1] %vm81_vm13, %v80_v44   ;;  %vm177_vm13 = vcmask 130144  }
  0x8e   :  { %88 = vst.msk [vmem:[#allocation0] sm:$0x1] %vm87_vm14, %v86_v45   ;;  %vm183_vm14 = vcmask 97344  }
  0x90   :  { %v92_v46 = vpop.permute.xlu0 %91   ;;  %v98_v47 = vpop.permute.xlu1 %97  }
  0x91   :  { %94 = vst.msk [vmem:[#allocation0] sm:$0x1] %vm93_vm15, %v92_v46   ;;  %vm189_vm15 = vcmask 64544  }
  0x92   :  { %100 = vst.msk [vmem:[#allocation0] sm:$0x1] %vm99_vm0, %v98_v47  }
  0x94   :  { %v104_v48 = vpop.permute.xlu0 %103   ;;  %v110_v49 = vpop.permute.xlu1 %109  }
  0x95   :  { %106 = vst.msk [vmem:[#allocation0] sm:$0x1] %vm105_vm1, %v104_v48  }
  0x96   :  { %112 = vst.msk [vmem:[#allocation0] sm:$0x1] %vm111_vm2, %v110_v49  }
  0x98   :  { %v116_v50 = vpop.permute.xlu0 %115   ;;  %v122_v51 = vpop.permute.xlu1 %121  }
  0x99   :  { %118 = vst.msk [vmem:[#allocation0] sm:$0x1] %vm117_vm3, %v116_v50  }
  0x9a   :  { %124 = vst.msk [vmem:[#allocation0] sm:$0x1] %vm123_vm4, %v122_v51  }
  0x9c   :  { %v128_v52 = vpop.permute.xlu0 %127   ;;  %v134_v53 = vpop.permute.xlu1 %133  }
  0x9d   :  { %130 = vst.msk [vmem:[#allocation0] sm:$0x1] %vm129_vm5, %v128_v52  }
  0x9e   :  { %136 = vst.msk [vmem:[#allocation0] sm:$0x1] %vm135_vm6, %v134_v53  }
  0xa0   :  { %v140_v54 = vpop.permute.xlu0 %139   ;;  %v146_v55 = vpop.permute.xlu1 %145  }
  0xa1   :  { %142 = vst.msk [vmem:[#allocation0] sm:$0x1] %vm141_vm7, %v140_v54  }
  0xa2   :  { %148 = vst.msk [vmem:[#allocation0] sm:$0x1] %vm147_vm8, %v146_v55  }
  0xa4   :  { %v152_v56 = vpop.permute.xlu0 %151   ;;  %v158_v57 = vpop.permute.xlu1 %157  }
  0xa5   :  { %154 = vst.msk [vmem:[#allocation0] sm:$0x1] %vm153_vm9, %v152_v56  }
  0xa6   :  { %160 = vst.msk [vmem:[#allocation0] sm:$0x1] %vm159_vm10, %v158_v57  }
  0xa8   :  { %v164_v58 = vpop.permute.xlu0 %163   ;;  %v170_v59 = vpop.permute.xlu1 %169  }
  0xa9   :  { %166 = vst.msk [vmem:[#allocation0] sm:$0x1] %vm165_vm11, %v164_v58  }
  0xaa   :  { %172 = vst.msk [vmem:[#allocation0] sm:$0x1] %vm171_vm12, %v170_v59  }
  0xac   :  { %v176_v60 = vpop.permute.xlu0 %175   ;;  %v182_v61 = vpop.permute.xlu1 %181  }
  0xad   :  { %178 = vst.msk [vmem:[#allocation0] sm:$0x1] %vm177_vm13, %v176_v60  }
  0xae   :  { %184 = vst.msk [vmem:[#allocation0] sm:$0x1] %vm183_vm14, %v182_v61  }
  0xb0   :  { %v188_v62 = vpop.permute.xlu0 %187  }
  0xb1   :  { %190 = vst.msk [vmem:[#allocation0] sm:$0x1] %vm189_vm15, %v188_v62  }
  0xb8   :  { %v194_v63 = vld [vmem:[#allocation0] sm:$0x1] }
  0xb9   :  { %196 = vst [vmem:[%s400_s1] sm:$0x1] %v194_v63 }

// kernel: basic_block_forward.4
= control target key start
LH: loop header
LB: loop body
LE: loop exit
PB: predicated region body
PF: predicated region fallthrough
CT: control target
= control target key end

     0   :  { %s82_s0 = inlined_call_operand.vmem [shape: f32[16,128], index: 0, kind: input, shape index: {}]   ;;  %s83_s1 = inlined_call_operand.vmem [shape: f32[1,128], index: 1, kind: input, shape index: {}]   ;;  %s84_s2 = inlined_call_operand.vmem [shape: f32[1,128], index: 2, kind: input, shape index: {}]   ;;  %s85_s3 = inlined_call_operand.vmem [shape: f32[16,128], index: 3, kind: output, shape index: {}]  }
   0x1   :  { %v14_v0 = vld [vmem:[%s82_s0] sm:$0xff]  ;;  %v15_v4 = vld [vmem:[%s82_s0 + $0x8] sm:$0xff] }
   0x2   :  { %v42_v1 = vld [vmem:[%s83_s1] ss:$0 sm:$0xff] }
   0x3   :  { %v43_v2 = vld [vmem:[%s84_s2] ss:$0 sm:$0xff]  ;;  %v23_v3 = vmul.f32 %v42_v1, %v14_v0  ;;  %v24_v5 = vmul.f32 %v42_v1, %v15_v4 }
   0x5   :  { %v32_v6 = vadd.f32 %v43_v2, %v23_v3  ;;  %v33_v7 = vadd.f32 %v43_v2, %v24_v5 }
   0x7   :  { %v34_v8 = vmax.f32 %v32_v6, 0.0  ;;  %v35_v9 = vmax.f32 %v33_v7, 0.0 }
   0x9   :  { %36 = vst [vmem:[%s85_s3] sm:$0xff] %v34_v8  ;;  %37 = vst [vmem:[%s85_s3 + $0x8] sm:$0xff] %v35_v9 }

// kernel: tile.42
= control target key start
LH: loop header
LB: loop body
LE: loop exit
PB: predicated region body
PF: predicated region fallthrough
CT: control target
= control target key end

     0   :  { %s28_s0 = inlined_call_operand.vmem [shape: f32[8], index: 0, kind: input, shape index: {}]   ;;  %s29_s1 = inlined_call_operand.vmem [shape: f32[16,8], index: 1, kind: output, shape index: {}]  }
   0x1   :  { %v4_v0 = vld [vmem:[%s28_s0] ss:$0 sm:$0xff] }
   0x2   :  { %5 = vst [vmem:[%s29_s1] sm:$0xff] %v4_v0  ;;  %8 = vst [vmem:[%s29_s1 + $0x8] sm:$0xff] %v4_v0 }

// kernel: tile.46
= control target key start
LH: loop header
LB: loop body
LE: loop exit
PB: predicated region body
PF: predicated region fallthrough
CT: control target
= control target key end

     0   :  { %s131_s10 = smov 120   ;;  %s132_s11 = smov 104   ;;  %vm3_vm0 = vcmask 64512   ;;  %vm9_vm1 = vcmask 1048512   ;;  %vm15_vm2 = vcmask 982912   ;;  %vm21_vm3 = vcmask 917312   ;;  %s207_s0 = inlined_call_operand.vmem [shape: f32[16,8], index: 0, kind: input, shape index: {}]   ;;  %s208_s1 = inlined_call_operand.vmem [shape: f32[1,128], index: 1, kind: output, shape index: {}]  }
   0x1   :  { %v101_v0 = vld [vmem:[%s207_s0 + $0xf] sm:$0x1]   ;;  %v103_v1 = vld [vmem:[%s207_s0 + $0xd] sm:$0x1]   ;;  %v102_v2 = vld [vmem:[%s207_s0 + $0xe] sm:$0x1]  }
   0x2   :  { %7 = vrot.lane.b32.xlu0 %v101_v0, %s131_s10  ;;  %19 = vrot.lane.b32.xlu1 %v103_v1, %s132_s11  ;;  %v104_v3 = vld [vmem:[%s207_s0 + $0xc] sm:$0x1]   ;;  %s133_s16 = smov 112   ;;  %s134_s17 = smov 96   ;;  %v105_v4 = vld [vmem:[%s207_s0 + $0xb] sm:$0x1]  }
   0x3   :  { %v106_v5 = vld [vmem:[%s207_s0 + $0xa] sm:$0x1]   ;;  %v2_v6 = vld [vmem:[%s207_s0] sm:$0x1]   ;;  %s135_s24 = smov 88   ;;  %s136_s25 = smov 80  }
   0x4   :  { %4 = vst.msk [vmem:[#allocation0] sm:$0x1] %vm3_vm0, %v2_v6   ;;  %v107_v7 = vld [vmem:[%s207_s0 + $0x9] sm:$0x1]   ;;  %v108_v8 = vld [vmem:[%s207_s0 + $0x8] sm:$0x1]  }
   0x5   :  { %s137_s30 = smov 72   ;;  %s138_s2 = smov 64   ;;  %v109_v9 = vld [vmem:[%s207_s0 + $0x7] sm:$0x1]   ;;  %v110_v10 = vld [vmem:[%s207_s0 + $0x6] sm:$0x1]  }
   0x6   :  { %13 = vrot.lane.b32.xlu0 %v102_v2, %s133_s16  ;;  %25 = vrot.lane.b32.xlu1 %v104_v3, %s134_s17  ;;  %s139_s7 = smov 56   ;;  %s140_s8 = smov 48   ;;  %v111_v11 = vld [vmem:[%s207_s0 + $0x5] sm:$0x1]   ;;  %v112_v12 = vld [vmem:[%s207_s0 + $0x4] sm:$0x1]  }
   0x7   :  { %s141_s13 = smov 40   ;;  %s142_s14 = smov 32   ;;  %v113_v13 = vld [vmem:[%s207_s0 + $0x3] sm:$0x1]   ;;  %v114_v14 = vld [vmem:[%s207_s0 + $0x2] sm:$0x1]  }
   0x8   :  { %s143_s19 = smov 24   ;;  %s144_s20 = smov 16   ;;  %v115_v15 = vld [vmem:[%s207_s0 + $0x1] sm:$0x1]   ;;  %vm27_vm4 = vcmask 851712   ;;  %vm33_vm5 = vcmask 786112  }
   0x9   :  { %s145_s0 = smov 8   ;;  %vm39_vm6 = vcmask 720512   ;;  %vm45_vm7 = vcmask 654912   ;;  %vm51_vm8 = vcmask 589312   ;;  %vm57_vm9 = vcmask 523712  }
   0xa   :  { %31 = vrot.lane.b32.xlu0 %v105_v4, %s135_s24  ;;  %37 = vrot.lane.b32.xlu1 %v106_v5, %s136_s25  ;;  %vm63_vm10 = vcmask 458112   ;;  %vm69_vm11 = vcmask 392512   ;;  %vm75_vm12 = vcmask 326912   ;;  %vm81_vm13 = vcmask 261312  }
   0xb   :  { %vm87_vm14 = vcmask 195712   ;;  %vm93_vm15 = vcmask 130112  }
   0xe   :  { %43 = vrot.lane.b32.xlu0 %v107_v7, %s137_s30  ;;  %49 = vrot.lane.b32.xlu1 %v108_v8, %s138_s2 }
  0x12   :  { %55 = vrot.lane.b32.xlu0 %v109_v9, %s139_s7  ;;  %61 = vrot.lane.b32.xlu1 %v110_v10, %s140_s8 }
  0x16   :  { %67 = vrot.lane.b32.xlu0 %v111_v11, %s141_s13  ;;  %73 = vrot.lane.b32.xlu1 %v112_v12, %s142_s14 }
  0x1a   :  { %79 = vrot.lane.b32.xlu0 %v113_v13, %s143_s19  ;;  %85 = vrot.lane.b32.xlu1 %v114_v14, %s144_s20 }
  0x1e   :  { %91 = vrot.lane.b32.xlu0 %v115_v15, %s145_s0 }
  0x74   :  { %v8_v16 = vpop.permute.xlu0 %7   ;;  %v20_v17 = vpop.permute.xlu1 %19  }
  0x75   :  { %10 = vst.msk [vmem:[#allocation0] sm:$0x1] %vm9_vm1, %v8_v16  }
  0x78   :  { %v14_v18 = vpop.permute.xlu0 %13   ;;  %v26_v19 = vpop.permute.xlu1 %25  }
  0x79   :  { %16 = vst.msk [vmem:[#allocation0] sm:$0x1] %vm15_vm2, %v14_v18  }
  0x7a   :  { %22 = vst.msk [vmem:[#allocation0] sm:$0x1] %vm21_vm3, %v20_v17  }
  0x7b   :  { %28 = vst.msk [vmem:[#allocation0] sm:$0x1] %vm27_vm4, %v26_v19  }
  0x7c   :  { %v32_v20 = vpop.permute.xlu0 %31   ;;  %v38_v21 = vpop.permute.xlu1 %37  }
  0x7d   :  { %34 = vst.msk [vmem:[#allocation0] sm:$0x1] %vm33_vm5, %v32_v20  }
  0x7e   :  { %40 = vst.msk [vmem:[#allocation0] sm:$0x1] %vm39_vm6, %v38_v21  }
  0x80   :  { %v44_v22 = vpop.permute.xlu0 %43   ;;  %v50_v23 = vpop.permute.xlu1 %49  }
  0x81   :  { %46 = vst.msk [vmem:[#allocation0] sm:$0x1] %vm45_vm7, %v44_v22  }
  0x82   :  { %52 = vst.msk [vmem:[#allocation0] sm:$0x1] %vm51_vm8, %v50_v23  }
  0x84   :  { %v56_v24 = vpop.permute.xlu0 %55   ;;  %v62_v25 = vpop.permute.xlu1 %61  }
  0x85   :  { %58 = vst.msk [vmem:[#allocation0] sm:$0x1] %vm57_vm9, %v56_v24  }
  0x86   :  { %64 = vst.msk [vmem:[#allocation0] sm:$0x1] %vm63_vm10, %v62_v25  }
  0x88   :  { %v68_v26 = vpop.permute.xlu0 %67   ;;  %v74_v27 = vpop.permute.xlu1 %73  }
  0x89   :  { %70 = vst.msk [vmem:[#allocation0] sm:$0x1] %vm69_vm11, %v68_v26  }
  0x8a   :  { %76 = vst.msk [vmem:[#allocation0] sm:$0x1] %vm75_vm12, %v74_v27  }
  0x8c   :  { %v80_v28 = vpop.permute.xlu0 %79   ;;  %v86_v29 = vpop.permute.xlu1 %85  }
  0x8d   :  { %82 = vst.msk [vmem:[#allocation0] sm:$0x1] %vm81_vm13, %v80_v28  }
  0x8e   :  { %88 = vst.msk [vmem:[#allocation0] sm:$0x1] %vm87_vm14, %v86_v29  }
  0x90   :  { %v92_v30 = vpop.permute.xlu0 %91  }
  0x91   :  { %94 = vst.msk [vmem:[#allocation0] sm:$0x1] %vm93_vm15, %v92_v30  }
  0x98   :  { %v98_v31 = vld [vmem:[#allocation0] sm:$0x1] }
  0x99   :  { %100 = vst [vmem:[%s208_s1] sm:$0x1] %v98_v31 }

// kernel: basic_block_forward.6
= control target key start
LH: loop header
LB: loop body
LE: loop exit
PB: predicated region body
PF: predicated region fallthrough
CT: control target
= control target key end

     0   :  { %v620_v36 = vmov 0.0   ;;  %vm621_vm0 = vmmov 0   ;;  %vm326_vm1 = vcmask 523264   ;;  %s773_s1 = inlined_call_operand.vmem [shape: bf16[576,128], index: 1, kind: input, shape index: {}]   ;;  %s774_s0 = inlined_call_operand.vmem [shape: bf16[8,576], index: 0, kind: input, shape index: {}]   ;;  %s775_s2 = inlined_call_operand.vmem [shape: f32[1,128], index: 2, kind: input, shape index: {}]   ;;  %s776_s3 = inlined_call_operand.vmem [shape: f32[1,128], index: 3, kind: input, shape index: {}]   ;;  %s777_s4 = inlined_call_operand.vmem [shape: f32[8,128], index: 4, kind: output, shape index: {}]  }
   0x1   :  { %v579_v0 = vld [vmem:[%s773_s1 + $0x40] sm:$0xff]   ;;  %v583_v4 = vld [vmem:[%s773_s1 + $0x48] sm:$0xff]   ;;  %v587_v8 = vld [vmem:[%s773_s1 + $0x50] sm:$0xff]  }
   0x2   :  { %v580_v1 = vld [vmem:[%s773_s1 + $0xc0] sm:$0xff]   ;;  %516 = vmatprep.subr.bf16.mxu0 %v579_v0  ;;  %v584_v5 = vld [vmem:[%s773_s1 + $0xc8] sm:$0xff]   ;;  %v588_v9 = vld [vmem:[%s773_s1 + $0xd0] sm:$0xff]  }
   0x3   :  { %v581_v2 = vld [vmem:[%s773_s1] sm:$0xff]   ;;  %538 = vmatprep.subr.bf16.mxu1 %v580_v1  ;;  %v585_v6 = vld [vmem:[%s773_s1 + $0x8] sm:$0xff]   ;;  %v589_v10 = vld [vmem:[%s773_s1 + $0x10] sm:$0xff]  }
   0x4   :  { %v582_v3 = vld [vmem:[%s773_s1 + $0x80] sm:$0xff]   ;;  %517 = vmatpush3.bf16.msra.mxu0 %v581_v2  ;;  %v586_v7 = vld [vmem:[%s773_s1 + $0x88] sm:$0xff]   ;;  %v590_v11 = vld [vmem:[%s773_s1 + $0x90] sm:$0xff]  }
   0x5   :  { %539 = vmatpush3.bf16.msra.mxu1 %v582_v3  ;;  %518 = vmatprep.subr.bf16.mxu0 %v583_v4  ;;  %v591_v12 = vld [vmem:[%s773_s1 + $0x58] sm:$0xff]   ;;  %v595_v16 = vld [vmem:[%s773_s1 + $0x60] sm:$0xff]   ;;  %v599_v20 = vld [vmem:[%s773_s1 + $0x68] sm:$0xff]  }
   0x6   :  { %540 = vmatprep.subr.bf16.mxu1 %v584_v5  ;;  %v592_v13 = vld [vmem:[%s773_s1 + $0xd8] sm:$0xff]   ;;  %v596_v17 = vld [vmem:[%s773_s1 + $0xe0] sm:$0xff]   ;;  %v600_v21 = vld [vmem:[%s773_s1 + $0xe8] sm:$0xff]  }
   0x7   :  { %v593_v14 = vld [vmem:[%s773_s1 + $0x18] sm:$0xff]   ;;  %v597_v18 = vld [vmem:[%s773_s1 + $0x20] sm:$0xff]   ;;  %v601_v22 = vld [vmem:[%s773_s1 + $0x28] sm:$0xff]  }
   0x8   :  { %519 = vmatpush3.bf16.msra.mxu0 %v585_v6  ;;  %v594_v15 = vld [vmem:[%s773_s1 + $0x98] sm:$0xff]   ;;  %v598_v19 = vld [vmem:[%s773_s1 + $0xa0] sm:$0xff]   ;;  %v602_v23 = vld [vmem:[%s773_s1 + $0xa8] sm:$0xff]  }
   0x9   :  { %541 = vmatpush3.bf16.msra.mxu1 %v586_v7  ;;  %520 = vmatprep.subr.bf16.mxu0 %v587_v8  ;;  %v603_v24 = vld [vmem:[%s773_s1 + $0x70] sm:$0xff]   ;;  %v607_v28 = vld [vmem:[%s773_s1 + $0x78] sm:$0xff]   ;;  %v18_v32 = vld [vmem:[%s774_s0] sm:$0xff] }
   0xa   :  { %542 = vmatprep.subr.bf16.mxu1 %v588_v9  ;;  %v604_v25 = vld [vmem:[%s773_s1 + $0xf0] sm:$0xff]   ;;  %v608_v29 = vld [vmem:[%s773_s1 + $0xf8] sm:$0xff]   ;;  %v472_v33 = vcombine.low %v18_v32, %v18_v32  ;;  %v473_v34 = vcombine.high %v18_v32, %v18_v32  ;;  %v19_v35 = vld [vmem:[%s774_s0 + $0x8] sm:$0xff] }
   0xb   :  { %v605_v26 = vld [vmem:[%s773_s1 + $0x30] sm:$0xff]   ;;  %v609_v30 = vld [vmem:[%s773_s1 + $0x38] sm:$0xff]   ;;  %v474_v37 = vcombine.low %v19_v35, %v19_v35  ;;  %v475_v38 = vcombine.high %v19_v35, %v19_v35  ;;  %v616_v39 = vld [vmem:[%s773_s1 + $0x100] sm:$0xff]  }
   0xc   :  { %521 = vmatpush3.bf16.msra.mxu0 %v589_v10  ;;  %v606_v27 = vld [vmem:[%s773_s1 + $0xb0] sm:$0xff]   ;;  %v610_v31 = vld [vmem:[%s773_s1 + $0xb8] sm:$0xff]   ;;  %362 = vmatprep.mubr.bf16.mxu0 %v473_v34  ;;  %v617_v40 = vld [vmem:[%s773_s1 + $0x108] sm:$0xff]  }
   0xd   :  { %543 = vmatpush3.bf16.msra.mxu1 %v590_v11  ;;  %522 = vmatprep.subr.bf16.mxu0 %v591_v12  ;;  %v618_v41 = vld [vmem:[%s773_s1 + $0x110] sm:$0xff]   ;;  %v619_v42 = vld [vmem:[%s773_s1 + $0x118] sm:$0xff]   ;;  %v514_v56 = vld [vmem:[%s775_s2] ss:$0 sm:$0xff] }
   0xe   :  { %544 = vmatprep.subr.bf16.mxu1 %v592_v13  ;;  %402 = vmatprep.mubr.bf16.mxu1 %v475_v38  ;;  %v613_v43 = vld [vmem:[%s774_s0 + $0x10] ss:$0 sps:$4 sm:$0xff]   ;;  %v515_v59 = vld [vmem:[%s776_s3] ss:$0 sm:$0xff] }
  0x10   :  { %523 = vmatpush3.bf16.msra.mxu0 %v593_v14 }
  0x11   :  { %545 = vmatpush3.bf16.msra.mxu1 %v594_v15  ;;  %524 = vmatprep.subr.bf16.mxu0 %v595_v16 }
  0x12   :  { %546 = vmatprep.subr.bf16.mxu1 %v596_v17 }
  0x14   :  { %525 = vmatpush3.bf16.msra.mxu0 %v597_v18 }
  0x15   :  { %547 = vmatpush3.bf16.msra.mxu1 %v598_v19  ;;  %526 = vmatprep.subr.bf16.mxu0 %v599_v20 }
  0x16   :  { %548 = vmatprep.subr.bf16.mxu1 %v600_v21 }
  0x18   :  { %527 = vmatpush3.bf16.msra.mxu0 %v601_v22 }
  0x19   :  { %549 = vmatpush3.bf16.msra.mxu1 %v602_v23  ;;  %528 = vmatprep.subr.bf16.mxu0 %v603_v24 }
  0x1a   :  { %550 = vmatprep.subr.bf16.mxu1 %v604_v25 }
  0x1c   :  { %529 = vmatpush3.bf16.msra.mxu0 %v605_v26 }
  0x1d   :  { %551 = vmatpush3.bf16.msra.mxu1 %v606_v27  ;;  %530 = vmatprep.subr.bf16.mxu0 %v607_v28 }
  0x1e   :  { %552 = vmatprep.subr.bf16.mxu1 %v608_v29 }
  0x20   :  { %531 = vmatpush3.bf16.msra.mxu0 %v609_v30 }
  0x21   :  { %553 = vmatpush3.bf16.msra.mxu1 %v610_v31  ;;  %565 = vmatprep.subr.bf16.mxu0 %v620_v36 }
  0x23   :  { %363 = vmatmul.mubr.bf16.vlgmr.msra.gmra.mrb[0].mxu0 %v472_v33 }
  0x24   :  { %403 = vmatmul.mubr.bf16.vlgmr.msra.gmra.mrb[0].mxu1 %v474_v37  ;;  %566 = vmatpush3.bf16.msra.mxu0 %v616_v39 }
  0x25   :  { %567 = vmatprep.subr.bf16.mxu0 %v620_v36  ;;  %573 = vmatprep.mubr.msk.bf16.mxu0 %vm621_vm0, %v620_v36 }
  0x28   :  { %568 = vmatpush3.bf16.msra.mxu0 %v617_v40 }
  0x29   :  { %569 = vmatprep.subr.bf16.mxu0 %v620_v36 }
  0x2c   :  { %570 = vmatpush3.bf16.msra.mxu0 %v618_v41 }
  0x2d   :  { %571 = vmatprep.subr.bf16.mxu0 %v620_v36 }
  0x30   :  { %572 = vmatpush3.bf16.msra.mxu0 %v619_v42 }
  0x33   :  { %574 = vmatmul.mubr.msk.bf16.vlgmr.msra.gmra.mrb[4].mxu0 %vm326_vm1, %v613_v43 }
  0xf6   :  { %v532_v44 = vpop.f32.mrb[0].mxu0 }
  0xf7   :  { %v554_v45 = vpop.f32.mrb[0].mxu1  ;;  %v533_v46 = vpop.f32.mrb[1].mxu0 }
  0xf8   :  { %v534_v47 = vadd.f32 %v533_v46, %v532_v44  ;;  %v555_v48 = vpop.f32.mrb[1].mxu1  ;;  %v535_v49 = vpop.f32.mrb[2].mxu0 }
  0xf9   :  { %v556_v50 = vadd.f32 %v555_v48, %v554_v45  ;;  %v536_v51 = vpop.f32.mrb[3].mxu0  ;;  %v557_v52 = vpop.f32.mrb[2].mxu1 }
  0xfa   :  { %v558_v53 = vpop.f32.mrb[3].mxu1 }
  0xfb   :  { %v405_v54 = vadd.f32 %v556_v50, %v534_v47 }
 0x106   :  { %v444_v55 = vpop.f32.mrb[4].mxu0 }
 0x107   :  { %v445_v57 = vadd.f32 %v444_v55, %v405_v54  ;;  %v575_v58 = vpop.f32.mrb[5].mxu0 }
 0x108   :  { %v447_v60 = vpop.f32.mrb[6].mxu0 }
 0x109   :  { %v457_v61 = vmul.f32 %v514_v56, %v445_v57  ;;  %v576_v62 = vpop.f32.mrb[7].mxu0 }
 0x10b   :  { %v465_v63 = vadd.f32 %v515_v59, %v457_v61 }
 0x10d   :  { %v466_v0 = vmax.f32 %v465_v63, 0.0 }
 0x10f   :  { %467 = vst [vmem:[%s777_s4] sm:$0xff] %v466_v0 }

// kernel: tile.34
= control target key start
LH: loop header
LB: loop body
LE: loop exit
PB: predicated region body
PF: predicated region fallthrough
CT: control target
= control target key end

     0   :  { %s28_s0 = inlined_call_operand.vmem [shape: f32[4], index: 0, kind: input, shape index: {}]   ;;  %s29_s1 = inlined_call_operand.vmem [shape: f32[16,4], index: 1, kind: output, shape index: {}]  }
   0x1   :  { %v4_v0 = vld [vmem:[%s28_s0] ss:$0 sm:$0xff] }
   0x2   :  { %5 = vst [vmem:[%s29_s1] sm:$0xff] %v4_v0  ;;  %8 = vst [vmem:[%s29_s1 + $0x8] sm:$0xff] %v4_v0 }

// kernel: tile.38
= control target key start
LH: loop header
LB: loop body
LE: loop exit
PB: predicated region body
PF: predicated region fallthrough
CT: control target
= control target key end

     0   :  { %s131_s10 = smov 60   ;;  %s132_s11 = smov 52   ;;  %vm3_vm0 = vcmask 31744   ;;  %vm9_vm1 = vcmask 523744   ;;  %vm15_vm2 = vcmask 490944   ;;  %vm21_vm3 = vcmask 458144   ;;  %s207_s0 = inlined_call_operand.vmem [shape: f32[16,4], index: 0, kind: input, shape index: {}]   ;;  %s208_s1 = inlined_call_operand.vmem [shape: f32[1,64], index: 1, kind: output, shape index: {}]  }
   0x1   :  { %v101_v0 = vld [vmem:[%s207_s0 + $0xf] sm:$0x1]   ;;  %v103_v1 = vld [vmem:[%s207_s0 + $0xd] sm:$0x1]   ;;  %v102_v2 = vld [vmem:[%s207_s0 + $0xe] sm:$0x1]  }
   0x2   :  { %7 = vrot.lane.b32.xlu0 %v101_v0, %s131_s10  ;;  %19 = vrot.lane.b32.xlu1 %v103_v1, %s132_s11  ;;  %v104_v3 = vld [vmem:[%s207_s0 + $0xc] sm:$0x1]   ;;  %s133_s16 = smov 56   ;;  %s134_s17 = smov 48   ;;  %v105_v4 = vld [vmem:[%s207_s0 + $0xb] sm:$0x1]  }
   0x3   :  { %v106_v5 = vld [vmem:[%s207_s0 + $0xa] sm:$0x1]   ;;  %v2_v6 = vld [vmem:[%s207_s0] sm:$0x1]   ;;  %s135_s24 = smov 44   ;;  %s136_s25 = smov 40  }
   0x4   :  { %4 = vst.msk [vmem:[#allocation0] sm:$0x1] %vm3_vm0, %v2_v6   ;;  %v107_v7 = vld [vmem:[%s207_s0 + $0x9] sm:$0x1]   ;;  %v108_v8 = vld [vmem:[%s207_s0 + $0x8] sm:$0x1]  }
   0x5   :  { %s137_s30 = smov 36   ;;  %s138_s2 = smov 32   ;;  %v109_v9 = vld [vmem:[%s207_s0 + $0x7] sm:$0x1]   ;;  %v110_v10 = vld [vmem:[%s207_s0 + $0x6] sm:$0x1]  }
   0x6   :  { %13 = vrot.lane.b32.xlu0 %v102_v2, %s133_s16  ;;  %25 = vrot.lane.b32.xlu1 %v104_v3, %s134_s17  ;;  %s139_s7 = smov 28   ;;  %s140_s8 = smov 24   ;;  %v111_v11 = vld [vmem:[%s207_s0 + $0x5] sm:$0x1]   ;;  %v112_v12 = vld [vmem:[%s207_s0 + $0x4] sm:$0x1]  }
   0x7   :  { %s141_s13 = smov 20   ;;  %s142_s14 = smov 16   ;;  %v113_v13 = vld [vmem:[%s207_s0 + $0x3] sm:$0x1]   ;;  %v114_v14 = vld [vmem:[%s207_s0 + $0x2] sm:$0x1]  }
   0x8   :  { %s143_s19 = smov 12   ;;  %s144_s20 = smov 8   ;;  %v115_v15 = vld [vmem:[%s207_s0 + $0x1] sm:$0x1]   ;;  %vm27_vm4 = vcmask 425344   ;;  %vm33_vm5 = vcmask 392544  }
   0x9   :  { %s145_s0 = smov 4   ;;  %vm39_vm6 = vcmask 359744   ;;  %vm45_vm7 = vcmask 326944   ;;  %vm51_vm8 = vcmask 294144   ;;  %vm57_vm9 = vcmask 261344  }
   0xa   :  { %31 = vrot.lane.b32.xlu0 %v105_v4, %s135_s24  ;;  %37 = vrot.lane.b32.xlu1 %v106_v5, %s136_s25  ;;  %vm63_vm10 = vcmask 228544   ;;  %vm69_vm11 = vcmask 195744   ;;  %vm75_vm12 = vcmask 162944   ;;  %vm81_vm13 = vcmask 130144  }
   0xb   :  { %vm87_vm14 = vcmask 97344   ;;  %vm93_vm15 = vcmask 64544  }
   0xe   :  { %43 = vrot.lane.b32.xlu0 %v107_v7, %s137_s30  ;;  %49 = vrot.lane.b32.xlu1 %v108_v8, %s138_s2 }
  0x12   :  { %55 = vrot.lane.b32.xlu0 %v109_v9, %s139_s7  ;;  %61 = vrot.lane.b32.xlu1 %v110_v10, %s140_s8 }
  0x16   :  { %67 = vrot.lane.b32.xlu0 %v111_v11, %s141_s13  ;;  %73 = vrot.lane.b32.xlu1 %v112_v12, %s142_s14 }
  0x1a   :  { %79 = vrot.lane.b32.xlu0 %v113_v13, %s143_s19  ;;  %85 = vrot.lane.b32.xlu1 %v114_v14, %s144_s20 }
  0x1e   :  { %91 = vrot.lane.b32.xlu0 %v115_v15, %s145_s0 }
  0x74   :  { %v8_v16 = vpop.permute.xlu0 %7   ;;  %v20_v17 = vpop.permute.xlu1 %19  }
  0x75   :  { %10 = vst.msk [vmem:[#allocation0] sm:$0x1] %vm9_vm1, %v8_v16  }
  0x78   :  { %v14_v18 = vpop.permute.xlu0 %13   ;;  %v26_v19 = vpop.permute.xlu1 %25  }
  0x79   :  { %16 = vst.msk [vmem:[#allocation0] sm:$0x1] %vm15_vm2, %v14_v18  }
  0x7a   :  { %22 = vst.msk [vmem:[#allocation0] sm:$0x1] %vm21_vm3, %v20_v17  }
  0x7b   :  { %28 = vst.msk [vmem:[#allocation0] sm:$0x1] %vm27_vm4, %v26_v19  }
  0x7c   :  { %v32_v20 = vpop.permute.xlu0 %31   ;;  %v38_v21 = vpop.permute.xlu1 %37  }
  0x7d   :  { %34 = vst.msk [vmem:[#allocation0] sm:$0x1] %vm33_vm5, %v32_v20  }
  0x7e   :  { %40 = vst.msk [vmem:[#allocation0] sm:$0x1] %vm39_vm6, %v38_v21  }
  0x80   :  { %v44_v22 = vpop.permute.xlu0 %43   ;;  %v50_v23 = vpop.permute.xlu1 %49  }
  0x81   :  { %46 = vst.msk [vmem:[#allocation0] sm:$0x1] %vm45_vm7, %v44_v22  }
  0x82   :  { %52 = vst.msk [vmem:[#allocation0] sm:$0x1] %vm51_vm8, %v50_v23  }
  0x84   :  { %v56_v24 = vpop.permute.xlu0 %55   ;;  %v62_v25 = vpop.permute.xlu1 %61  }
  0x85   :  { %58 = vst.msk [vmem:[#allocation0] sm:$0x1] %vm57_vm9, %v56_v24  }
  0x86   :  { %64 = vst.msk [vmem:[#allocation0] sm:$0x1] %vm63_vm10, %v62_v25  }
  0x88   :  { %v68_v26 = vpop.permute.xlu0 %67   ;;  %v74_v27 = vpop.permute.xlu1 %73  }
  0x89   :  { %70 = vst.msk [vmem:[#allocation0] sm:$0x1] %vm69_vm11, %v68_v26  }
  0x8a   :  { %76 = vst.msk [vmem:[#allocation0] sm:$0x1] %vm75_vm12, %v74_v27  }
  0x8c   :  { %v80_v28 = vpop.permute.xlu0 %79   ;;  %v86_v29 = vpop.permute.xlu1 %85  }
  0x8d   :  { %82 = vst.msk [vmem:[#allocation0] sm:$0x1] %vm81_vm13, %v80_v28  }
  0x8e   :  { %88 = vst.msk [vmem:[#allocation0] sm:$0x1] %vm87_vm14, %v86_v29  }
  0x90   :  { %v92_v30 = vpop.permute.xlu0 %91  }
  0x91   :  { %94 = vst.msk [vmem:[#allocation0] sm:$0x1] %vm93_vm15, %v92_v30  }
  0x98   :  { %v98_v31 = vld [vmem:[#allocation0] sm:$0x1] }
  0x99   :  { %100 = vst [vmem:[%s208_s1] sm:$0x1] %v98_v31 }

// kernel: basic_block_forward.5
= control target key start
LH: loop header
LB: loop body
LE: loop exit
PB: predicated region body
PF: predicated region fallthrough
CT: control target
= control target key end

     0   :  { %v148_v0 = vmov 0.0   ;;  %vm149_vm0 = vmmov 0   ;;  %vm69_vm1 = vcmask 523264   ;;  %s199_s1 = inlined_call_operand.vmem [shape: bf16[64,128], index: 1, kind: input, shape index: {}]   ;;  %s200_s0 = inlined_call_operand.vmem [shape: bf16[8,64], index: 0, kind: input, shape index: {}]   ;;  %s201_s2 = inlined_call_operand.vmem [shape: f32[1,64], index: 2, kind: input, shape index: {}]   ;;  %s202_s3 = inlined_call_operand.vmem [shape: f32[1,64], index: 3, kind: input, shape index: {}]   ;;  %s203_s4 = inlined_call_operand.vmem [shape: f32[8,128], index: 4, kind: output, shape index: {}]  }
   0x1   :  { %130 = vmatprep.subr.bf16.mxu0 %v148_v0  ;;  %v144_v1 = vld [vmem:[%s199_s1] sm:$0xff]   ;;  %138 = vmatprep.mubr.msk.bf16.mxu0 %vm149_vm0, %v148_v0  ;;  %v145_v2 = vld [vmem:[%s199_s1 + $0x8] sm:$0xff]   ;;  %v146_v6 = vld [vmem:[%s199_s1 + $0x10] sm:$0xff]  }
   0x2   :  { %131 = vmatpush3.bf16.msra.mxu0 %v144_v1  ;;  %v18_v3 = vld [vmem:[%s200_s0] sm:$0xf]  ;;  %v147_v10 = vld [vmem:[%s199_s1 + $0x18] sm:$0xff]  }
   0x3   :  { %132 = vmatprep.subr.bf16.mxu0 %v148_v0  ;;  %v118_v4 = vld [vmem:[%s201_s2] ss:$0 sm:$0xff]  ;;  %v19_v5 = vunpack.c.l.bf16 %v18_v3 }
   0x4   :  { %v119_v7 = vld [vmem:[%s202_s3] ss:$0 sm:$0xff] }
   0x5   :  { %v27_v8 = vmul.f32 %v118_v4, %v19_v5 }
   0x6   :  { %133 = vmatpush3.bf16.msra.mxu0 %v145_v2 }
   0x7   :  { %134 = vmatprep.subr.bf16.mxu0 %v148_v0  ;;  %v35_v9 = vadd.f32 %v119_v7, %v27_v8 }
   0x9   :  { %v36_v11 = vpack.c.bf16 %v35_v9, %v35_v9 }
   0xa   :  { %135 = vmatpush3.bf16.msra.mxu0 %v146_v6 }
   0xb   :  { %136 = vmatprep.subr.bf16.mxu0 %v148_v0 }
   0xe   :  { %137 = vmatpush3.bf16.msra.mxu0 %v147_v10 }
  0x11   :  { %139 = vmatmul.mubr.msk.bf16.vlgmr.msra.gmra.mrb[0].mxu0 %vm69_vm1, %v36_v11 }
  0xe4   :  { %v107_v12 = vpop.f32.mrb[0].mxu0 }
  0xe5   :  { %113 = vst [vmem:[%s203_s4] sm:$0xff] %v107_v12  ;;  %v140_v13 = vpop.f32.mrb[1].mxu0 }
  0xe6   :  { %v110_v14 = vpop.f32.mrb[2].mxu0 }
  0xe7   :  { %v141_v15 = vpop.f32.mrb[3].mxu0 }

// kernel: basic_block_forward.7
= control target key start
LH: loop header
LB: loop body
LE: loop exit
PB: predicated region body
PF: predicated region fallthrough
CT: control target
= control target key end

     0   :  { %vm1116_vm0 = vmmov 0   ;;  %s1374_s1 = inlined_call_operand.vmem [shape: bf16[1152,128], index: 1, kind: input, shape index: {}]   ;;  %s1375_s0 = inlined_call_operand.vmem [shape: bf16[8,1152], index: 0, kind: input, shape index: {}]   ;;  %s1376_s2 = inlined_call_operand.vmem [shape: f32[8,128], index: 2, kind: input, shape index: {}]   ;;  %s1377_s3 = inlined_call_operand.vmem [shape: f32[8,128], index: 3, kind: output, shape index: {}]  }
   0x1   :  { %v1034_v0 = vld [vmem:[%s1374_s1 + $0x40] sm:$0xff]   ;;  %v1038_v4 = vld [vmem:[%s1374_s1 + $0x48] sm:$0xff]   ;;  %v1042_v8 = vld [vmem:[%s1374_s1 + $0x50] sm:$0xff]  }
   0x2   :  { %v1035_v1 = vld [vmem:[%s1374_s1] sm:$0xff]   ;;  %915 = vmatprep.subr.bf16.mxu0 %v1034_v0  ;;  %v1039_v5 = vld [vmem:[%s1374_s1 + $0x8] sm:$0xff]   ;;  %v1043_v9 = vld [vmem:[%s1374_s1 + $0x10] sm:$0xff]  }
   0x3   :  { %v1036_v2 = vld [vmem:[%s1374_s1 + $0xc0] sm:$0xff]   ;;  %916 = vmatpush3.bf16.msra.mxu0 %v1035_v1  ;;  %v1040_v6 = vld [vmem:[%s1374_s1 + $0xc8] sm:$0xff]   ;;  %v1044_v10 = vld [vmem:[%s1374_s1 + $0xd0] sm:$0xff]  }
   0x4   :  { %v1037_v3 = vld [vmem:[%s1374_s1 + $0x80] sm:$0xff]   ;;  %937 = vmatprep.subr.bf16.mxu1 %v1036_v2  ;;  %917 = vmatprep.subr.bf16.mxu0 %v1038_v4  ;;  %v1041_v7 = vld [vmem:[%s1374_s1 + $0x88] sm:$0xff]   ;;  %v1045_v11 = vld [vmem:[%s1374_s1 + $0x90] sm:$0xff]  }
   0x5   :  { %938 = vmatpush3.bf16.msra.mxu1 %v1037_v3  ;;  %v1046_v12 = vld [vmem:[%s1374_s1 + $0x58] sm:$0xff]   ;;  %v1050_v16 = vld [vmem:[%s1374_s1 + $0x60] sm:$0xff]   ;;  %v1054_v20 = vld [vmem:[%s1374_s1 + $0x68] sm:$0xff]  }
   0x6   :  { %939 = vmatprep.subr.bf16.mxu1 %v1040_v6  ;;  %v1047_v13 = vld [vmem:[%s1374_s1 + $0x18] sm:$0xff]   ;;  %v1051_v17 = vld [vmem:[%s1374_s1 + $0x20] sm:$0xff]   ;;  %v1055_v21 = vld [vmem:[%s1374_s1 + $0x28] sm:$0xff]  }
   0x7   :  { %918 = vmatpush3.bf16.msra.mxu0 %v1039_v5  ;;  %v1048_v14 = vld [vmem:[%s1374_s1 + $0xd8] sm:$0xff]   ;;  %v1052_v18 = vld [vmem:[%s1374_s1 + $0xe0] sm:$0xff]   ;;  %v1056_v22 = vld [vmem:[%s1374_s1 + $0xe8] sm:$0xff]  }
   0x8   :  { %919 = vmatprep.subr.bf16.mxu0 %v1042_v8  ;;  %v1049_v15 = vld [vmem:[%s1374_s1 + $0x98] sm:$0xff]   ;;  %v1053_v19 = vld [vmem:[%s1374_s1 + $0xa0] sm:$0xff]   ;;  %v1057_v23 = vld [vmem:[%s1374_s1 + $0xa8] sm:$0xff]  }
   0x9   :  { %940 = vmatpush3.bf16.msra.mxu1 %v1041_v7  ;;  %v1058_v24 = vld [vmem:[%s1374_s1 + $0x70] sm:$0xff]   ;;  %v1062_v28 = vld [vmem:[%s1374_s1 + $0x78] sm:$0xff]   ;;  %v15_v31 = vld [vmem:[%s1375_s0] sm:$0xff] }
   0xa   :  { %941 = vmatprep.subr.bf16.mxu1 %v1044_v10  ;;  %v1059_v25 = vld [vmem:[%s1374_s1 + $0x30] sm:$0xff]   ;;  %v1063_v29 = vld [vmem:[%s1374_s1 + $0x38] sm:$0xff]   ;;  %v834_v32 = vcombine.low %v15_v31, %v15_v31  ;;  %v835_v33 = vcombine.high %v15_v31, %v15_v31  ;;  %v1068_v35 = vld [vmem:[%s1374_s1 + $0x140] sm:$0xff]  }
   0xb   :  { %920 = vmatpush3.bf16.msra.mxu0 %v1043_v9  ;;  %v1060_v26 = vld [vmem:[%s1374_s1 + $0xf0] sm:$0xff]   ;;  %v1064_v30 = vld [vmem:[%s1374_s1 + $0xf8] sm:$0xff]   ;;  %v16_v36 = vld [vmem:[%s1375_s0 + $0x8] sm:$0xff]  ;;  %v1115_v9 = vmov 0.0  }
   0xc   :  { %921 = vmatprep.subr.bf16.mxu0 %v1046_v12  ;;  %v1061_v27 = vld [vmem:[%s1374_s1 + $0xb0] sm:$0xff]   ;;  %v1067_v34 = vld [vmem:[%s1374_s1 + $0xb8] sm:$0xff]   ;;  %661 = vmatprep.mubr.bf16.mxu0 %v835_v33  ;;  %v836_v37 = vcombine.low %v16_v36, %v16_v36  ;;  %v837_v38 = vcombine.high %v16_v36, %v16_v36  ;;  %v1071_v39 = vld [vmem:[%s1374_s1 + $0x100] sm:$0xff]  }
   0xd   :  { %942 = vmatpush3.bf16.msra.mxu1 %v1045_v11  ;;  %v1072_v40 = vld [vmem:[%s1374_s1 + $0x1c0] sm:$0xff]   ;;  %v1074_v42 = vld [vmem:[%s1374_s1 + $0x148] sm:$0xff]   ;;  %v1078_v46 = vld [vmem:[%s1374_s1 + $0x150] sm:$0xff]  }
   0xe   :  { %943 = vmatprep.subr.bf16.mxu1 %v1048_v14  ;;  %701 = vmatprep.mubr.bf16.mxu1 %v837_v38  ;;  %v1073_v41 = vld [vmem:[%s1374_s1 + $0x180] sm:$0xff]   ;;  %v1075_v43 = vld [vmem:[%s1374_s1 + $0x108] sm:$0xff]   ;;  %v1079_v47 = vld [vmem:[%s1374_s1 + $0x110] sm:$0xff]  }
   0xf   :  { %922 = vmatpush3.bf16.msra.mxu0 %v1047_v13  ;;  %v1076_v44 = vld [vmem:[%s1374_s1 + $0x1c8] sm:$0xff]   ;;  %v1080_v48 = vld [vmem:[%s1374_s1 + $0x1d0] sm:$0xff]   ;;  %v1082_v50 = vld [vmem:[%s1374_s1 + $0x158] sm:$0xff]  }
  0x10   :  { %923 = vmatprep.subr.bf16.mxu0 %v1050_v16  ;;  %v1077_v45 = vld [vmem:[%s1374_s1 + $0x188] sm:$0xff]   ;;  %v1081_v49 = vld [vmem:[%s1374_s1 + $0x190] sm:$0xff]   ;;  %v1083_v51 = vld [vmem:[%s1374_s1 + $0x118] sm:$0xff]  }
  0x11   :  { %944 = vmatpush3.bf16.msra.mxu1 %v1049_v15  ;;  %v1084_v52 = vld [vmem:[%s1374_s1 + $0x1d8] sm:$0xff]   ;;  %v1086_v54 = vld [vmem:[%s1374_s1 + $0x160] sm:$0xff]   ;;  %v1090_v58 = vld [vmem:[%s1374_s1 + $0x168] sm:$0xff]  }
  0x12   :  { %945 = vmatprep.subr.bf16.mxu1 %v1052_v18  ;;  %v1085_v53 = vld [vmem:[%s1374_s1 + $0x198] sm:$0xff]   ;;  %v1087_v55 = vld [vmem:[%s1374_s1 + $0x120] sm:$0xff]   ;;  %v1091_v59 = vld [vmem:[%s1374_s1 + $0x128] sm:$0xff]  }
  0x13   :  { %924 = vmatpush3.bf16.msra.mxu0 %v1051_v17  ;;  %v1088_v56 = vld [vmem:[%s1374_s1 + $0x1e0] sm:$0xff]   ;;  %v1092_v60 = vld [vmem:[%s1374_s1 + $0x1e8] sm:$0xff]   ;;  %v1094_v62 = vld [vmem:[%s1374_s1 + $0x170] sm:$0xff]  }
  0x14   :  { %925 = vmatprep.subr.bf16.mxu0 %v1054_v20  ;;  %v1089_v57 = vld [vmem:[%s1374_s1 + $0x1a0] sm:$0xff]   ;;  %v1093_v61 = vld [vmem:[%s1374_s1 + $0x1a8] sm:$0xff]   ;;  %v1095_v63 = vld [vmem:[%s1374_s1 + $0x130] sm:$0xff]  }
  0x15   :  { %946 = vmatpush3.bf16.msra.mxu1 %v1053_v19  ;;  %v1096_v0 = vld [vmem:[%s1374_s1 + $0x1f0] sm:$0xff]   ;;  %v1098_v2 = vld [vmem:[%s1374_s1 + $0x178] sm:$0xff]   ;;  %v1106_v13 = vld [vmem:[%s1374_s1 + $0x200] sm:$0xff]  }
  0x16   :  { %947 = vmatprep.subr.bf16.mxu1 %v1056_v22  ;;  %v1097_v1 = vld [vmem:[%s1374_s1 + $0x1b0] sm:$0xff]   ;;  %v1099_v3 = vld [vmem:[%s1374_s1 + $0x138] sm:$0xff]   ;;  %v1107_v14 = vld [vmem:[%s1374_s1 + $0x208] sm:$0xff]  }
  0x17   :  { %926 = vmatpush3.bf16.msra.mxu0 %v1055_v21  ;;  %v1100_v4 = vld [vmem:[%s1374_s1 + $0x1f8] sm:$0xff]   ;;  %v17_v5 = vld [vmem:[%s1375_s0 + $0x10] sm:$0xff]  ;;  %v1110_v17 = vld [vmem:[%s1374_s1 + $0x220] sm:$0xff]  }
  0x18   :  { %927 = vmatprep.subr.bf16.mxu0 %v1058_v24  ;;  %v838_v6 = vcombine.low %v17_v5, %v17_v5  ;;  %v839_v7 = vcombine.high %v17_v5, %v17_v5  ;;  %v1103_v8 = vld [vmem:[%s1374_s1 + $0x1b8] sm:$0xff]   ;;  %v1108_v15 = vld [vmem:[%s1374_s1 + $0x210] sm:$0xff]   ;;  %v1111_v18 = vld [vmem:[%s1374_s1 + $0x228] sm:$0xff]  }
  0x19   :  { %948 = vmatpush3.bf16.msra.mxu1 %v1057_v23  ;;  %v18_v10 = vld [vmem:[%s1375_s0 + $0x18] sm:$0xff]  ;;  %v1112_v19 = vld [vmem:[%s1374_s1 + $0x230] sm:$0xff]   ;;  %v1114_v21 = vld [vmem:[%s1375_s0 + $0x20] ss:$0 sps:$4 sm:$0xff]  }
  0x1a   :  { %949 = vmatprep.subr.bf16.mxu1 %v1060_v26  ;;  %v840_v11 = vcombine.low %v18_v10, %v18_v10  ;;  %v841_v12 = vcombine.high %v18_v10, %v18_v10  ;;  %v1109_v16 = vld [vmem:[%s1374_s1 + $0x218] sm:$0xff]   ;;  %v164_v23 = vld [vmem:[%s1376_s2] sm:$0xff] }
  0x1b   :  { %928 = vmatpush3.bf16.msra.mxu0 %v1059_v25  ;;  %v1113_v20 = vld [vmem:[%s1374_s1 + $0x238] sm:$0xff]  }
  0x1c   :  { %929 = vmatprep.subr.bf16.mxu0 %v1062_v28 }
  0x1d   :  { %950 = vmatpush3.bf16.msra.mxu1 %v1061_v27 }
  0x1e   :  { %951 = vmatprep.subr.bf16.mxu1 %v1064_v30 }
  0x1f   :  { %930 = vmatpush3.bf16.msra.mxu0 %v1063_v29 }
  0x20   :  { %959 = vmatprep.subr.bf16.mxu0 %v1068_v35 }
  0x21   :  { %952 = vmatpush3.bf16.msra.mxu1 %v1067_v34 }
  0x22   :  { %662 = vmatmul.mubr.bf16.vlgmr.msra.gmra.mrb[0].mxu0 %v834_v32  ;;  %981 = vmatprep.subr.bf16.mxu1 %v1072_v40 }
  0x23   :  { %960 = vmatpush3.bf16.msra.mxu0 %v1071_v39  ;;  %741 = vmatprep.mubr.bf16.mxu0 %v839_v7 }
  0x24   :  { %702 = vmatmul.mubr.bf16.vlgmr.msra.gmra.mrb[0].mxu1 %v836_v37  ;;  %961 = vmatprep.subr.bf16.mxu0 %v1074_v42 }
  0x25   :  { %982 = vmatpush3.bf16.msra.mxu1 %v1073_v41  ;;  %781 = vmatprep.mubr.bf16.mxu1 %v841_v12 }
  0x26   :  { %983 = vmatprep.subr.bf16.mxu1 %v1076_v44 }
  0x27   :  { %962 = vmatpush3.bf16.msra.mxu0 %v1075_v43 }
  0x28   :  { %963 = vmatprep.subr.bf16.mxu0 %v1078_v46 }
  0x29   :  { %984 = vmatpush3.bf16.msra.mxu1 %v1077_v45 }
  0x2a   :  { %985 = vmatprep.subr.bf16.mxu1 %v1080_v48 }
  0x2b   :  { %964 = vmatpush3.bf16.msra.mxu0 %v1079_v47 }
  0x2c   :  { %965 = vmatprep.subr.bf16.mxu0 %v1082_v50 }
  0x2d   :  { %986 = vmatpush3.bf16.msra.mxu1 %v1081_v49 }
  0x2e   :  { %987 = vmatprep.subr.bf16.mxu1 %v1084_v52 }
  0x2f   :  { %966 = vmatpush3.bf16.msra.mxu0 %v1083_v51 }
  0x30   :  { %967 = vmatprep.subr.bf16.mxu0 %v1086_v54 }
  0x31   :  { %988 = vmatpush3.bf16.msra.mxu1 %v1085_v53 }
  0x32   :  { %989 = vmatprep.subr.bf16.mxu1 %v1088_v56 }
  0x33   :  { %968 = vmatpush3.bf16.msra.mxu0 %v1087_v55 }
  0x34   :  { %969 = vmatprep.subr.bf16.mxu0 %v1090_v58 }
  0x35   :  { %990 = vmatpush3.bf16.msra.mxu1 %v1089_v57 }
  0x36   :  { %991 = vmatprep.subr.bf16.mxu1 %v1092_v60 }
  0x37   :  { %970 = vmatpush3.bf16.msra.mxu0 %v1091_v59 }
  0x38   :  { %971 = vmatprep.subr.bf16.mxu0 %v1094_v62 }
  0x39   :  { %992 = vmatpush3.bf16.msra.mxu1 %v1093_v61 }
  0x3a   :  { %993 = vmatprep.subr.bf16.mxu1 %v1096_v0 }
  0x3b   :  { %972 = vmatpush3.bf16.msra.mxu0 %v1095_v63 }
  0x3c   :  { %973 = vmatprep.subr.bf16.mxu0 %v1098_v2 }
  0x3d   :  { %994 = vmatpush3.bf16.msra.mxu1 %v1097_v1 }
  0x3e   :  { %995 = vmatprep.subr.bf16.mxu1 %v1100_v4 }
  0x3f   :  { %974 = vmatpush3.bf16.msra.mxu0 %v1099_v3 }
  0x40   :  { %1012 = vmatprep.subr.bf16.mxu0 %v1115_v9 }
  0x41   :  { %996 = vmatpush3.bf16.msra.mxu1 %v1103_v8 }
  0x42   :  { %742 = vmatmul.mubr.bf16.vlgmr.msra.gmra.mrb[4].mxu0 %v838_v6 }
  0x43   :  { %1013 = vmatpush3.bf16.msra.mxu0 %v1106_v13  ;;  %1028 = vmatprep.mubr.msk.bf16.mxu0 %vm1116_vm0, %v1115_v9 }
  0x44   :  { %782 = vmatmul.mubr.bf16.vlgmr.msra.gmra.mrb[4].mxu1 %v840_v11  ;;  %1014 = vmatprep.subr.bf16.mxu0 %v1115_v9 }
  0x47   :  { %1015 = vmatpush3.bf16.msra.mxu0 %v1107_v14 }
  0x48   :  { %1016 = vmatprep.subr.bf16.mxu0 %v1115_v9 }
  0x4b   :  { %1017 = vmatpush3.bf16.msra.mxu0 %v1108_v15 }
  0x4c   :  { %1018 = vmatprep.subr.bf16.mxu0 %v1115_v9 }
  0x4f   :  { %1019 = vmatpush3.bf16.msra.mxu0 %v1109_v16 }
  0x50   :  { %1020 = vmatprep.subr.bf16.mxu0 %v1115_v9 }
  0x53   :  { %1021 = vmatpush3.bf16.msra.mxu0 %v1110_v17 }
  0x54   :  { %1022 = vmatprep.subr.bf16.mxu0 %v1115_v9 }
  0x57   :  { %1023 = vmatpush3.bf16.msra.mxu0 %v1111_v18 }
  0x58   :  { %1024 = vmatprep.subr.bf16.mxu0 %v1115_v9 }
  0x5b   :  { %1025 = vmatpush3.bf16.msra.mxu0 %v1112_v19 }
  0x5c   :  { %1026 = vmatprep.subr.bf16.mxu0 %v1115_v9 }
  0x5f   :  { %1027 = vmatpush3.bf16.msra.mxu0 %v1113_v20 }
  0x62   :  { %1029 = vmatmul.mubr.bf16.vlgmr.msra.gmra.mrb[8].mxu0 %v1114_v21 }
  0xf5   :  { %v931_v22 = vpop.f32.mrb[0].mxu0 }
  0xf6   :  { %v932_v24 = vpop.f32.mrb[1].mxu0 }
  0xf7   :  { %v933_v25 = vadd.f32 %v932_v24, %v931_v22  ;;  %v934_v26 = vpop.f32.mrb[2].mxu0  ;;  %v953_v27 = vpop.f32.mrb[0].mxu1 }
  0xf8   :  { %v935_v28 = vpop.f32.mrb[3].mxu0  ;;  %v954_v29 = vpop.f32.mrb[1].mxu1 }
  0xf9   :  { %v664_v30 = vadd.f32 %v933_v25, %v164_v23  ;;  %v955_v31 = vadd.f32 %v954_v29, %v953_v27  ;;  %v956_v32 = vpop.f32.mrb[2].mxu1 }
  0xfa   :  { %v957_v33 = vpop.f32.mrb[3].mxu1 }
  0xfb   :  { %v704_v34 = vadd.f32 %v955_v31, %v664_v30 }
 0x115   :  { %v975_v35 = vpop.f32.mrb[4].mxu0 }
 0x116   :  { %v976_v36 = vpop.f32.mrb[5].mxu0 }
 0x117   :  { %v977_v37 = vadd.f32 %v976_v36, %v975_v35  ;;  %v978_v38 = vpop.f32.mrb[6].mxu0  ;;  %v997_v39 = vpop.f32.mrb[4].mxu1 }
 0x118   :  { %v979_v40 = vpop.f32.mrb[7].mxu0  ;;  %v998_v41 = vpop.f32.mrb[5].mxu1 }
 0x119   :  { %v744_v42 = vadd.f32 %v977_v37, %v704_v34  ;;  %v999_v43 = vadd.f32 %v998_v41, %v997_v39  ;;  %v1000_v44 = vpop.f32.mrb[6].mxu1 }
 0x11a   :  { %v1001_v45 = vpop.f32.mrb[7].mxu1 }
 0x11b   :  { %v784_v46 = vadd.f32 %v999_v43, %v744_v42 }
 0x135   :  { %v823_v47 = vpop.f32.mrb[8].mxu0 }
 0x136   :  { %v824_v48 = vadd.f32 %v823_v47, %v784_v46  ;;  %v1030_v49 = vpop.f32.mrb[9].mxu0 }
 0x137   :  { %v826_v50 = vpop.f32.mrb[10].mxu0 }
 0x138   :  { %829 = vst [vmem:[%s1377_s3] sm:$0xff] %v824_v48  ;;  %v1031_v51 = vpop.f32.mrb[11].mxu0 }

</bundles_post_ra>
